<compile_context>
chip_gen: v6e
topology: v6e:2x2x1
jax: 0.10.0
libtpu: 0.0.40
codegen_flags: <defaults>
</compile_context>

<pallas_src>
import functools

import jax
import jax.numpy as jnp
from jax.experimental import pallas as pl
from jax.experimental.pallas import tpu as pltpu


# ------------------------------ fused kernel ----------------------------------
def _make_fused_kernel(n_layers, S, B, E, H):
    """Builds a kernel for a fixed (n_layers, S, B_tile, E, H).

    Kernel ref layout (inputs then outputs):
      x_ref:                       (S, B, E)        time-major embedded input
      per layer l: wih_l (in,4H), whh_l (H,4H), b_l (1,4H)   gate order i,f,o,g
      h0_ref, c0_ref:              (n_layers, B, H)
      head_w_ref:                  (H, out)          collapsed fc1@fc2@fc3
      head_b_ref:                  (1, out)
      sig_ref:                     (B, out)          sigmoid of last timestep
      hn_ref, cn_ref:              (n_layers, B, H)  final states
    """

    def kernel(*refs):
        idx = 0
        x_ref = refs[idx]; idx += 1
        layer_w = []
        for _ in range(n_layers):
            layer_w.append((refs[idx], refs[idx + 1], refs[idx + 2]))
            idx += 3
        h0_ref, c0_ref, head_w_ref, head_b_ref = refs[idx:idx + 4]
        idx += 4
        sig_ref, hn_ref, cn_ref = refs[idx:idx + 3]

        # (S, B, E) -> (S*B, E): B is a multiple of 8, so this collapse is
        # layout-trivial (leading dim folds into the sublane dimension).
        layer_in = x_ref[...].reshape(S * B, -1)

        h = None
        for l in range(n_layers):
            wih_ref, whh_ref, b_ref = layer_w[l]
            # Hoisted input projection + bias: one MXU matmul for the whole
            # sequence of this layer.
            zx = (jnp.dot(layer_in, wih_ref[...],
                          preferred_element_type=jnp.float32)
                  + b_ref[...])                                   # (S*B, 4H)

            whh = whh_ref[...]
            h = h0_ref[l]                                         # (B, H)
            c = c0_ref[l]                                         # (B, H)
            ys = []
            # Fully unrolled recurrence (S is small & static).
            for t in range(S):
                z = zx[t * B:(t + 1) * B, :] + jnp.dot(
                    h, whh, preferred_element_type=jnp.float32)   # (B, 4H)
                zs = jax.nn.sigmoid(z[:, :3 * H])                 # i | f | o
                i_g = zs[:, 0:H]
                f_g = zs[:, H:2 * H]
                o_g = zs[:, 2 * H:3 * H]
                g_g = jnp.tanh(z[:, 3 * H:])                      # g
                c = f_g * c + i_g * g_g
                h = o_g * jnp.tanh(c)
                if l + 1 < n_layers:
                    ys.append(h)

            hn_ref[l] = h
            cn_ref[l] = c
            if l + 1 < n_layers:
                # Time-major (S*B, H) input for the next layer; stays in VMEM.
                # (nn.LSTM inter-layer dropout is identity in eval.)
                layer_in = jnp.concatenate(ys, axis=0)

        # Head only on the last timestep of the final layer (== h_n[-1]);
        # fc1/fc2/fc3 collapsed into a single matmul, then sigmoid.
        logit = jnp.dot(h, head_w_ref[...],
                        preferred_element_type=jnp.float32) + head_b_ref[...]
        sig_ref[...] = jax.nn.sigmoid(logit)

    return kernel


# ------------------------------ full forward pass ------------------------------
def sentimental_lstm_forward(params, x_tokens, hidden):
    """x_tokens: (B, S) int32; hidden: (h0, c0) each (n_layers, B, H)."""
    h0_all, c0_all = hidden
    n_layers, B, H = h0_all.shape
    S = x_tokens.shape[1]
    E = params["embedding"].shape[1]
    out_dim = params["head_w"].shape[1]     # == output_size (assumed 1 below)

    B_TILE = 8
    B_pad = ((B + B_TILE - 1) // B_TILE) * B_TILE

    # Embedding lookup (glue; gather stays in plain JAX) and time-major layout.
    embedd = jnp.take(params["embedding"], x_tokens, axis=0)     # (B, S, E)
    x_tm = jnp.transpose(embedd, (1, 0, 2))                      # (S, B, E)
    if B_pad != B:
        x_tm = jnp.pad(x_tm, ((0, 0), (0, B_pad - B), (0, 0)))
        h0_all = jnp.pad(h0_all, ((0, 0), (0, B_pad - B), (0, 0)))
        c0_all = jnp.pad(c0_all, ((0, 0), (0, B_pad - B), (0, 0)))

    inputs = [x_tm]
    in_specs = [pl.BlockSpec((S, B_TILE, E), lambda i: (0, i, 0))]
    for l in range(n_layers):
        wih = params[f"w_ih_l{l}_t"]
        whh = params[f"w_hh_l{l}_t"]
        b = params[f"b_l{l}"]
        inputs += [wih, whh, b]
        in_specs += [
            pl.BlockSpec(wih.shape, lambda i: (0, 0)),
            pl.BlockSpec(whh.shape, lambda i: (0, 0)),
            pl.BlockSpec(b.shape, lambda i: (0, 0)),
        ]
    inputs += [h0_all, c0_all, params["head_w"], params["head_b"]]
    in_specs += [
        pl.BlockSpec((n_layers, B_TILE, H), lambda i: (0, i, 0)),
        pl.BlockSpec((n_layers, B_TILE, H), lambda i: (0, i, 0)),
        pl.BlockSpec(params["head_w"].shape, lambda i: (0, 0)),
        pl.BlockSpec(params["head_b"].shape, lambda i: (0, 0)),
    ]

    out_shape = (
        jax.ShapeDtypeStruct((B_pad, out_dim), jnp.float32),
        jax.ShapeDtypeStruct((n_layers, B_pad, H), jnp.float32),
        jax.ShapeDtypeStruct((n_layers, B_pad, H), jnp.float32),
    )
    out_specs = (
        pl.BlockSpec((B_TILE, out_dim), lambda i: (i, 0)),
        pl.BlockSpec((n_layers, B_TILE, H), lambda i: (0, i, 0)),
        pl.BlockSpec((n_layers, B_TILE, H), lambda i: (0, i, 0)),
    )

    kernel = _make_fused_kernel(n_layers, S, B_TILE, E, H)

    sig, hn, cn = pl.pallas_call(
        kernel,
        out_shape=out_shape,
        grid=(B_pad // B_TILE,),
        in_specs=in_specs,
        out_specs=out_specs,
        compiler_params=pltpu.CompilerParams(
            dimension_semantics=("parallel",)),   # shards batch tiles on v7x
    )(*inputs)

    # PyTorch: sig_out.view(batch, -1)[:, -1]  (equivalent for output_size==1):
    # the last timestep's sigmoid(fc(h)) per batch element.
    sig_out = sig[:B, 0]                                        # (B,)
    hidden_out = (hn[:, :B, :], cn[:, :B, :])
    return sig_out, hidden_out


# ---------------------------------- params -----------------------------------
def _ifgo_to_ifog(w, H):
    """Permute PyTorch gate order (i, f, g, o) -> (i, f, o, g) along axis 0."""
    return jnp.concatenate(
        [w[0:2 * H], w[3 * H:4 * H], w[2 * H:3 * H]], axis=0)


def init_params(key, vocab_size, output_size, embedding_dim, hidden_dim, n_layers):
    keys = iter(jax.random.split(key, 4 * n_layers + 8))
    H = hidden_dim
    p = {}
    p["embedding"] = jax.random.normal(
        next(keys), (vocab_size, embedding_dim), jnp.float32) * 0.1

    for l in range(n_layers):
        in_dim = embedding_dim if l == 0 else hidden_dim
        # PyTorch layout: (4H, in) / (4H, H), gate order (i, f, g, o).
        w_ih = jax.random.normal(next(keys), (4 * H, in_dim), jnp.float32) * 0.1
        w_hh = jax.random.normal(next(keys), (4 * H, H), jnp.float32) * 0.1
        b_ih = jax.random.normal(next(keys), (4 * H,), jnp.float32) * 0.1
        b_hh = jax.random.normal(next(keys), (4 * H,), jnp.float32) * 0.1
        # Permute gates to (i, f, o, g), then transpose to (in, 4H).
        p[f"w_ih_l{l}_t"] = _ifgo_to_ifog(w_ih, H).T
        p[f"w_hh_l{l}_t"] = _ifgo_to_ifog(w_hh, H).T
        p[f"b_l{l}"] = _ifgo_to_ifog(b_ih + b_hh, H).reshape(1, -1)

    def linear(k, in_d, out_d):
        kw, kb = jax.random.split(k)
        w = jax.random.normal(kw, (out_d, in_d), jnp.float32) * 0.1
        b = jax.random.normal(kb, (out_d,), jnp.float32) * 0.1
        return w.T, b.reshape(1, -1)

    w1_t, b1 = linear(next(keys), hidden_dim, 64)
    w2_t, b2 = linear(next(keys), 64, 16)
    w3_t, b3 = linear(next(keys), 16, output_size)
    # Eval-mode dropout is identity and there is no nonlinearity between
    # fc1/fc2/fc3, so the chain collapses exactly to one affine map.
    p["head_w"] = w1_t @ w2_t @ w3_t                      # (H, output_size)
    p["head_b"] = (b1 @ w2_t + b2) @ w3_t + b3            # (1, output_size)
    return p


def init_hidden(n_layers, batch_size, hidden_dim):
    z = jnp.zeros((n_layers, batch_size, hidden_dim), jnp.float32)
    return (z, z)


# ------------------------------------ main ------------------------------------
if __name__ == "__main__":
    vocab_size = 50
    output_size = 1
    embedding_dim = 32
    hidden_dim = 32
    n_layers = 2
    batch = 2
    seq = 8

    key = jax.random.PRNGKey(0)
    k_params, k_tokens = jax.random.split(key)

    params = init_params(k_params, vocab_size, output_size,
                         embedding_dim, hidden_dim, n_layers)
    x = jax.random.randint(k_tokens, (batch, seq), 0, vocab_size, jnp.int32)
    hidden = init_hidden(n_layers, batch, hidden_dim)

    fwd = jax.jit(functools.partial(sentimental_lstm_forward, params))
    sig_out, (h_n, c_n) = fwd(x, hidden)
    jax.block_until_ready((sig_out, h_n, c_n))

    assert sig_out.shape == (batch,)
    assert h_n.shape == (n_layers, batch, hidden_dim)
    assert c_n.shape == (n_layers, batch, hidden_dim)
    print("KERNEL_OK")
</pallas_src>

<mosaic_0001>
module attributes {stable_mosaic.version = 11 : i64} {
  func.func @kernel(%arg0: i32, %arg1: memref<8x8x32xf32, #tpu.memory_space<vmem>>, %arg2: memref<32x128xf32, #tpu.memory_space<vmem>>, %arg3: memref<32x128xf32, #tpu.memory_space<vmem>>, %arg4: memref<1x128xf32, #tpu.memory_space<vmem>>, %arg5: memref<32x128xf32, #tpu.memory_space<vmem>>, %arg6: memref<32x128xf32, #tpu.memory_space<vmem>>, %arg7: memref<1x128xf32, #tpu.memory_space<vmem>>, %arg8: memref<2x8x32xf32, #tpu.memory_space<vmem>>, %arg9: memref<2x8x32xf32, #tpu.memory_space<vmem>>, %arg10: memref<32x1xf32, #tpu.memory_space<vmem>>, %arg11: memref<1x1xf32, #tpu.memory_space<vmem>>, %arg12: memref<8x1xf32, #tpu.memory_space<vmem>>, %arg13: memref<2x8x32xf32, #tpu.memory_space<vmem>>, %arg14: memref<2x8x32xf32, #tpu.memory_space<vmem>>) attributes {dimension_semantics = [#tpu.dimension_semantics<parallel>], iteration_bounds = array<i64: 1>, scalar_prefetch = 0 : i64, scratch_operands = 0 : i64, tpu.core_type = #tpu.core_type<tc>, window_params = [{transform_indices = @transform_0, window_bounds = array<i64: 8, 8, 32>}, {pipeline_mode = #tpu.pipeline_mode<synchronous>, transform_indices = @transform_1, window_bounds = array<i64: 32, 128>}, {pipeline_mode = #tpu.pipeline_mode<synchronous>, transform_indices = @transform_2, window_bounds = array<i64: 32, 128>}, {pipeline_mode = #tpu.pipeline_mode<synchronous>, transform_indices = @transform_3, window_bounds = array<i64: 1, 128>}, {pipeline_mode = #tpu.pipeline_mode<synchronous>, transform_indices = @transform_4, window_bounds = array<i64: 32, 128>}, {pipeline_mode = #tpu.pipeline_mode<synchronous>, transform_indices = @transform_5, window_bounds = array<i64: 32, 128>}, {pipeline_mode = #tpu.pipeline_mode<synchronous>, transform_indices = @transform_6, window_bounds = array<i64: 1, 128>}, {transform_indices = @transform_7, window_bounds = array<i64: 2, 8, 32>}, {transform_indices = @transform_8, window_bounds = array<i64: 2, 8, 32>}, {pipeline_mode = #tpu.pipeline_mode<synchronous>, transform_indices = @transform_9, window_bounds = array<i64: 32, 1>}, {pipeline_mode = #tpu.pipeline_mode<synchronous>, transform_indices = @transform_10, window_bounds = array<i64: 1, 1>}, {transform_indices = @transform_11, window_bounds = array<i64: 8, 1>}, {transform_indices = @transform_12, window_bounds = array<i64: 2, 8, 32>}, {transform_indices = @transform_13, window_bounds = array<i64: 2, 8, 32>}]} {
    %c0 = arith.constant 0 : index
    %c0_0 = arith.constant 0 : index
    %c0_1 = arith.constant 0 : index
    %0 = vector.load %arg1[%c0, %c0_0, %c0_1] : memref<8x8x32xf32, #tpu.memory_space<vmem>>, vector<8x8x32xf32>
    %1 = vector.shape_cast %0 : vector<8x8x32xf32> to vector<64x32xf32>
    %c0_2 = arith.constant 0 : index
    %c0_3 = arith.constant 0 : index
    %2 = vector.load %arg2[%c0_2, %c0_3] : memref<32x128xf32, #tpu.memory_space<vmem>>, vector<32x128xf32>
    %cst = arith.constant dense<0.000000e+00> : vector<64x128xf32>
    %3 = tpu.matmul %1, %2, %cst {dimension_numbers = #tpu.dot_dimension_numbers<[1], [0], [0], [1], [0, 0, 1, 1], [], []>} : vector<64x32xf32>, vector<32x128xf32>, vector<64x128xf32> -> vector<64x128xf32>
    %c0_4 = arith.constant 0 : index
    %c0_5 = arith.constant 0 : index
    %4 = vector.load %arg4[%c0_4, %c0_5] : memref<1x128xf32, #tpu.memory_space<vmem>>, vector<1x128xf32>
    %5 = vector.broadcast %4 : vector<1x128xf32> to vector<64x128xf32>
    %6 = arith.addf %3, %5 : vector<64x128xf32>
    %c0_6 = arith.constant 0 : index
    %c0_7 = arith.constant 0 : index
    %7 = vector.load %arg3[%c0_6, %c0_7] : memref<32x128xf32, #tpu.memory_space<vmem>>, vector<32x128xf32>
    %c0_8 = arith.constant 0 : index
    %c0_9 = arith.constant 0 : index
    %c0_10 = arith.constant 0 : index
    %8 = vector.load %arg8[%c0_8, %c0_9, %c0_10] : memref<2x8x32xf32, #tpu.memory_space<vmem>>, vector<1x8x32xf32>
    %9 = vector.shape_cast %8 : vector<1x8x32xf32> to vector<8x32xf32>
    %c0_11 = arith.constant 0 : index
    %c0_12 = arith.constant 0 : index
    %c0_13 = arith.constant 0 : index
    %10 = vector.load %arg9[%c0_11, %c0_12, %c0_13] : memref<2x8x32xf32, #tpu.memory_space<vmem>>, vector<1x8x32xf32>
    %11 = vector.shape_cast %10 : vector<1x8x32xf32> to vector<8x32xf32>
    %12 = vector.extract_strided_slice %6 {offsets = [0, 0], sizes = [8, 128], strides = [1, 1]} : vector<64x128xf32> to vector<8x128xf32>
    %cst_14 = arith.constant dense<0.000000e+00> : vector<8x128xf32>
    %13 = tpu.matmul %9, %7, %cst_14 {dimension_numbers = #tpu.dot_dimension_numbers<[1], [0], [0], [1], [0, 0, 1, 1], [], []>} : vector<8x32xf32>, vector<32x128xf32>, vector<8x128xf32> -> vector<8x128xf32>
    %14 = arith.addf %12, %13 : vector<8x128xf32>
    %15 = vector.extract_strided_slice %14 {offsets = [0, 0], sizes = [8, 96], strides = [1, 1]} : vector<8x128xf32> to vector<8x96xf32>
    %16 = arith.negf %15 : vector<8x96xf32>
    %17 = math.exp %16 : vector<8x96xf32>
    %cst_15 = arith.constant 1.000000e+00 : f32
    %18 = vector.broadcast %cst_15 : f32 to vector<8x96xf32>
    %19 = arith.addf %18, %17 : vector<8x96xf32>
    %20 = arith.divf %18, %19 : vector<8x96xf32>
    %21 = vector.extract_strided_slice %20 {offsets = [0, 0], sizes = [8, 32], strides = [1, 1]} : vector<8x96xf32> to vector<8x32xf32>
    %22 = vector.extract_strided_slice %20 {offsets = [0, 32], sizes = [8, 32], strides = [1, 1]} : vector<8x96xf32> to vector<8x32xf32>
    %23 = vector.extract_strided_slice %20 {offsets = [0, 64], sizes = [8, 32], strides = [1, 1]} : vector<8x96xf32> to vector<8x32xf32>
    %24 = vector.extract_strided_slice %14 {offsets = [0, 96], sizes = [8, 32], strides = [1, 1]} : vector<8x128xf32> to vector<8x32xf32>
    %25 = math.tanh %24 : vector<8x32xf32>
    %26 = arith.mulf %22, %11 : vector<8x32xf32>
    %27 = arith.mulf %21, %25 : vector<8x32xf32>
    %28 = arith.addf %26, %27 : vector<8x32xf32>
    %29 = math.tanh %28 : vector<8x32xf32>
    %30 = arith.mulf %23, %29 : vector<8x32xf32>
    %31 = vector.extract_strided_slice %6 {offsets = [8, 0], sizes = [8, 128], strides = [1, 1]} : vector<64x128xf32> to vector<8x128xf32>
    %cst_16 = arith.constant dense<0.000000e+00> : vector<8x128xf32>
    %32 = tpu.matmul %30, %7, %cst_16 {dimension_numbers = #tpu.dot_dimension_numbers<[1], [0], [0], [1], [0, 0, 1, 1], [], []>} : vector<8x32xf32>, vector<32x128xf32>, vector<8x128xf32> -> vector<8x128xf32>
    %33 = arith.addf %31, %32 : vector<8x128xf32>
    %34 = vector.extract_strided_slice %33 {offsets = [0, 0], sizes = [8, 96], strides = [1, 1]} : vector<8x128xf32> to vector<8x96xf32>
    %35 = arith.negf %34 : vector<8x96xf32>
    %36 = math.exp %35 : vector<8x96xf32>
    %cst_17 = arith.constant 1.000000e+00 : f32
    %37 = vector.broadcast %cst_17 : f32 to vector<8x96xf32>
    %38 = arith.addf %37, %36 : vector<8x96xf32>
    %39 = arith.divf %37, %38 : vector<8x96xf32>
    %40 = vector.extract_strided_slice %39 {offsets = [0, 0], sizes = [8, 32], strides = [1, 1]} : vector<8x96xf32> to vector<8x32xf32>
    %41 = vector.extract_strided_slice %39 {offsets = [0, 32], sizes = [8, 32], strides = [1, 1]} : vector<8x96xf32> to vector<8x32xf32>
    %42 = vector.extract_strided_slice %39 {offsets = [0, 64], sizes = [8, 32], strides = [1, 1]} : vector<8x96xf32> to vector<8x32xf32>
    %43 = vector.extract_strided_slice %33 {offsets = [0, 96], sizes = [8, 32], strides = [1, 1]} : vector<8x128xf32> to vector<8x32xf32>
    %44 = math.tanh %43 : vector<8x32xf32>
    %45 = arith.mulf %41, %28 : vector<8x32xf32>
    %46 = arith.mulf %40, %44 : vector<8x32xf32>
    %47 = arith.addf %45, %46 : vector<8x32xf32>
    %48 = math.tanh %47 : vector<8x32xf32>
    %49 = arith.mulf %42, %48 : vector<8x32xf32>
    %50 = vector.extract_strided_slice %6 {offsets = [16, 0], sizes = [8, 128], strides = [1, 1]} : vector<64x128xf32> to vector<8x128xf32>
    %cst_18 = arith.constant dense<0.000000e+00> : vector<8x128xf32>
    %51 = tpu.matmul %49, %7, %cst_18 {dimension_numbers = #tpu.dot_dimension_numbers<[1], [0], [0], [1], [0, 0, 1, 1], [], []>} : vector<8x32xf32>, vector<32x128xf32>, vector<8x128xf32> -> vector<8x128xf32>
    %52 = arith.addf %50, %51 : vector<8x128xf32>
    %53 = vector.extract_strided_slice %52 {offsets = [0, 0], sizes = [8, 96], strides = [1, 1]} : vector<8x128xf32> to vector<8x96xf32>
    %54 = arith.negf %53 : vector<8x96xf32>
    %55 = math.exp %54 : vector<8x96xf32>
    %cst_19 = arith.constant 1.000000e+00 : f32
    %56 = vector.broadcast %cst_19 : f32 to vector<8x96xf32>
    %57 = arith.addf %56, %55 : vector<8x96xf32>
    %58 = arith.divf %56, %57 : vector<8x96xf32>
    %59 = vector.extract_strided_slice %58 {offsets = [0, 0], sizes = [8, 32], strides = [1, 1]} : vector<8x96xf32> to vector<8x32xf32>
    %60 = vector.extract_strided_slice %58 {offsets = [0, 32], sizes = [8, 32], strides = [1, 1]} : vector<8x96xf32> to vector<8x32xf32>
    %61 = vector.extract_strided_slice %58 {offsets = [0, 64], sizes = [8, 32], strides = [1, 1]} : vector<8x96xf32> to vector<8x32xf32>
    %62 = vector.extract_strided_slice %52 {offsets = [0, 96], sizes = [8, 32], strides = [1, 1]} : vector<8x128xf32> to vector<8x32xf32>
    %63 = math.tanh %62 : vector<8x32xf32>
    %64 = arith.mulf %60, %47 : vector<8x32xf32>
    %65 = arith.mulf %59, %63 : vector<8x32xf32>
    %66 = arith.addf %64, %65 : vector<8x32xf32>
    %67 = math.tanh %66 : vector<8x32xf32>
    %68 = arith.mulf %61, %67 : vector<8x32xf32>
    %69 = vector.extract_strided_slice %6 {offsets = [24, 0], sizes = [8, 128], strides = [1, 1]} : vector<64x128xf32> to vector<8x128xf32>
    %cst_20 = arith.constant dense<0.000000e+00> : vector<8x128xf32>
    %70 = tpu.matmul %68, %7, %cst_20 {dimension_numbers = #tpu.dot_dimension_numbers<[1], [0], [0], [1], [0, 0, 1, 1], [], []>} : vector<8x32xf32>, vector<32x128xf32>, vector<8x128xf32> -> vector<8x128xf32>
    %71 = arith.addf %69, %70 : vector<8x128xf32>
    %72 = vector.extract_strided_slice %71 {offsets = [0, 0], sizes = [8, 96], strides = [1, 1]} : vector<8x128xf32> to vector<8x96xf32>
    %73 = arith.negf %72 : vector<8x96xf32>
    %74 = math.exp %73 : vector<8x96xf32>
    %cst_21 = arith.constant 1.000000e+00 : f32
    %75 = vector.broadcast %cst_21 : f32 to vector<8x96xf32>
    %76 = arith.addf %75, %74 : vector<8x96xf32>
    %77 = arith.divf %75, %76 : vector<8x96xf32>
    %78 = vector.extract_strided_slice %77 {offsets = [0, 0], sizes = [8, 32], strides = [1, 1]} : vector<8x96xf32> to vector<8x32xf32>
    %79 = vector.extract_strided_slice %77 {offsets = [0, 32], sizes = [8, 32], strides = [1, 1]} : vector<8x96xf32> to vector<8x32xf32>
    %80 = vector.extract_strided_slice %77 {offsets = [0, 64], sizes = [8, 32], strides = [1, 1]} : vector<8x96xf32> to vector<8x32xf32>
    %81 = vector.extract_strided_slice %71 {offsets = [0, 96], sizes = [8, 32], strides = [1, 1]} : vector<8x128xf32> to vector<8x32xf32>
    %82 = math.tanh %81 : vector<8x32xf32>
    %83 = arith.mulf %79, %66 : vector<8x32xf32>
    %84 = arith.mulf %78, %82 : vector<8x32xf32>
    %85 = arith.addf %83, %84 : vector<8x32xf32>
    %86 = math.tanh %85 : vector<8x32xf32>
    %87 = arith.mulf %80, %86 : vector<8x32xf32>
    %88 = vector.extract_strided_slice %6 {offsets = [32, 0], sizes = [8, 128], strides = [1, 1]} : vector<64x128xf32> to vector<8x128xf32>
    %cst_22 = arith.constant dense<0.000000e+00> : vector<8x128xf32>
    %89 = tpu.matmul %87, %7, %cst_22 {dimension_numbers = #tpu.dot_dimension_numbers<[1], [0], [0], [1], [0, 0, 1, 1], [], []>} : vector<8x32xf32>, vector<32x128xf32>, vector<8x128xf32> -> vector<8x128xf32>
    %90 = arith.addf %88, %89 : vector<8x128xf32>
    %91 = vector.extract_strided_slice %90 {offsets = [0, 0], sizes = [8, 96], strides = [1, 1]} : vector<8x128xf32> to vector<8x96xf32>
    %92 = arith.negf %91 : vector<8x96xf32>
    %93 = math.exp %92 : vector<8x96xf32>
    %cst_23 = arith.constant 1.000000e+00 : f32
    %94 = vector.broadcast %cst_23 : f32 to vector<8x96xf32>
    %95 = arith.addf %94, %93 : vector<8x96xf32>
    %96 = arith.divf %94, %95 : vector<8x96xf32>
    %97 = vector.extract_strided_slice %96 {offsets = [0, 0], sizes = [8, 32], strides = [1, 1]} : vector<8x96xf32> to vector<8x32xf32>
    %98 = vector.extract_strided_slice %96 {offsets = [0, 32], sizes = [8, 32], strides = [1, 1]} : vector<8x96xf32> to vector<8x32xf32>
    %99 = vector.extract_strided_slice %96 {offsets = [0, 64], sizes = [8, 32], strides = [1, 1]} : vector<8x96xf32> to vector<8x32xf32>
    %100 = vector.extract_strided_slice %90 {offsets = [0, 96], sizes = [8, 32], strides = [1, 1]} : vector<8x128xf32> to vector<8x32xf32>
    %101 = math.tanh %100 : vector<8x32xf32>
    %102 = arith.mulf %98, %85 : vector<8x32xf32>
    %103 = arith.mulf %97, %101 : vector<8x32xf32>
    %104 = arith.addf %102, %103 : vector<8x32xf32>
    %105 = math.tanh %104 : vector<8x32xf32>
    %106 = arith.mulf %99, %105 : vector<8x32xf32>
    %107 = vector.extract_strided_slice %6 {offsets = [40, 0], sizes = [8, 128], strides = [1, 1]} : vector<64x128xf32> to vector<8x128xf32>
    %cst_24 = arith.constant dense<0.000000e+00> : vector<8x128xf32>
    %108 = tpu.matmul %106, %7, %cst_24 {dimension_numbers = #tpu.dot_dimension_numbers<[1], [0], [0], [1], [0, 0, 1, 1], [], []>} : vector<8x32xf32>, vector<32x128xf32>, vector<8x128xf32> -> vector<8x128xf32>
    %109 = arith.addf %107, %108 : vector<8x128xf32>
    %110 = vector.extract_strided_slice %109 {offsets = [0, 0], sizes = [8, 96], strides = [1, 1]} : vector<8x128xf32> to vector<8x96xf32>
    %111 = arith.negf %110 : vector<8x96xf32>
    %112 = math.exp %111 : vector<8x96xf32>
    %cst_25 = arith.constant 1.000000e+00 : f32
    %113 = vector.broadcast %cst_25 : f32 to vector<8x96xf32>
    %114 = arith.addf %113, %112 : vector<8x96xf32>
    %115 = arith.divf %113, %114 : vector<8x96xf32>
    %116 = vector.extract_strided_slice %115 {offsets = [0, 0], sizes = [8, 32], strides = [1, 1]} : vector<8x96xf32> to vector<8x32xf32>
    %117 = vector.extract_strided_slice %115 {offsets = [0, 32], sizes = [8, 32], strides = [1, 1]} : vector<8x96xf32> to vector<8x32xf32>
    %118 = vector.extract_strided_slice %115 {offsets = [0, 64], sizes = [8, 32], strides = [1, 1]} : vector<8x96xf32> to vector<8x32xf32>
    %119 = vector.extract_strided_slice %109 {offsets = [0, 96], sizes = [8, 32], strides = [1, 1]} : vector<8x128xf32> to vector<8x32xf32>
    %120 = math.tanh %119 : vector<8x32xf32>
    %121 = arith.mulf %117, %104 : vector<8x32xf32>
    %122 = arith.mulf %116, %120 : vector<8x32xf32>
    %123 = arith.addf %121, %122 : vector<8x32xf32>
    %124 = math.tanh %123 : vector<8x32xf32>
    %125 = arith.mulf %118, %124 : vector<8x32xf32>
    %126 = vector.extract_strided_slice %6 {offsets = [48, 0], sizes = [8, 128], strides = [1, 1]} : vector<64x128xf32> to vector<8x128xf32>
    %cst_26 = arith.constant dense<0.000000e+00> : vector<8x128xf32>
    %127 = tpu.matmul %125, %7, %cst_26 {dimension_numbers = #tpu.dot_dimension_numbers<[1], [0], [0], [1], [0, 0, 1, 1], [], []>} : vector<8x32xf32>, vector<32x128xf32>, vector<8x128xf32> -> vector<8x128xf32>
    %128 = arith.addf %126, %127 : vector<8x128xf32>
    %129 = vector.extract_strided_slice %128 {offsets = [0, 0], sizes = [8, 96], strides = [1, 1]} : vector<8x128xf32> to vector<8x96xf32>
    %130 = arith.negf %129 : vector<8x96xf32>
    %131 = math.exp %130 : vector<8x96xf32>
    %cst_27 = arith.constant 1.000000e+00 : f32
    %132 = vector.broadcast %cst_27 : f32 to vector<8x96xf32>
    %133 = arith.addf %132, %131 : vector<8x96xf32>
    %134 = arith.divf %132, %133 : vector<8x96xf32>
    %135 = vector.extract_strided_slice %134 {offsets = [0, 0], sizes = [8, 32], strides = [1, 1]} : vector<8x96xf32> to vector<8x32xf32>
    %136 = vector.extract_strided_slice %134 {offsets = [0, 32], sizes = [8, 32], strides = [1, 1]} : vector<8x96xf32> to vector<8x32xf32>
    %137 = vector.extract_strided_slice %134 {offsets = [0, 64], sizes = [8, 32], strides = [1, 1]} : vector<8x96xf32> to vector<8x32xf32>
    %138 = vector.extract_strided_slice %128 {offsets = [0, 96], sizes = [8, 32], strides = [1, 1]} : vector<8x128xf32> to vector<8x32xf32>
    %139 = math.tanh %138 : vector<8x32xf32>
    %140 = arith.mulf %136, %123 : vector<8x32xf32>
    %141 = arith.mulf %135, %139 : vector<8x32xf32>
    %142 = arith.addf %140, %141 : vector<8x32xf32>
    %143 = math.tanh %142 : vector<8x32xf32>
    %144 = arith.mulf %137, %143 : vector<8x32xf32>
    %145 = vector.extract_strided_slice %6 {offsets = [56, 0], sizes = [8, 128], strides = [1, 1]} : vector<64x128xf32> to vector<8x128xf32>
    %cst_28 = arith.constant dense<0.000000e+00> : vector<8x128xf32>
    %146 = tpu.matmul %144, %7, %cst_28 {dimension_numbers = #tpu.dot_dimension_numbers<[1], [0], [0], [1], [0, 0, 1, 1], [], []>} : vector<8x32xf32>, vector<32x128xf32>, vector<8x128xf32> -> vector<8x128xf32>
    %147 = arith.addf %145, %146 : vector<8x128xf32>
    %148 = vector.extract_strided_slice %147 {offsets = [0, 0], sizes = [8, 96], strides = [1, 1]} : vector<8x128xf32> to vector<8x96xf32>
    %149 = arith.negf %148 : vector<8x96xf32>
    %150 = math.exp %149 : vector<8x96xf32>
    %cst_29 = arith.constant 1.000000e+00 : f32
    %151 = vector.broadcast %cst_29 : f32 to vector<8x96xf32>
    %152 = arith.addf %151, %150 : vector<8x96xf32>
    %153 = arith.divf %151, %152 : vector<8x96xf32>
    %154 = vector.extract_strided_slice %153 {offsets = [0, 0], sizes = [8, 32], strides = [1, 1]} : vector<8x96xf32> to vector<8x32xf32>
    %155 = vector.extract_strided_slice %153 {offsets = [0, 32], sizes = [8, 32], strides = [1, 1]} : vector<8x96xf32> to vector<8x32xf32>
    %156 = vector.extract_strided_slice %153 {offsets = [0, 64], sizes = [8, 32], strides = [1, 1]} : vector<8x96xf32> to vector<8x32xf32>
    %157 = vector.extract_strided_slice %147 {offsets = [0, 96], sizes = [8, 32], strides = [1, 1]} : vector<8x128xf32> to vector<8x32xf32>
    %158 = math.tanh %157 : vector<8x32xf32>
    %159 = arith.mulf %155, %142 : vector<8x32xf32>
    %160 = arith.mulf %154, %158 : vector<8x32xf32>
    %161 = arith.addf %159, %160 : vector<8x32xf32>
    %162 = math.tanh %161 : vector<8x32xf32>
    %163 = arith.mulf %156, %162 : vector<8x32xf32>
    %c0_30 = arith.constant 0 : index
    %c0_31 = arith.constant 0 : index
    %c0_32 = arith.constant 0 : index
    %164 = vector.load %arg13[%c0_30, %c0_31, %c0_32] : memref<2x8x32xf32, #tpu.memory_space<vmem>>, vector<1x8x32xf32>
    %165 = vector.shape_cast %164 : vector<1x8x32xf32> to vector<8x32xf32>
    %166 = vector.shape_cast %163 : vector<8x32xf32> to vector<1x8x32xf32>
    tpu.vector_store %arg13[%c0_30, %c0_31, %c0_32], %166 {strides = array<i32>} : memref<2x8x32xf32, #tpu.memory_space<vmem>>, vector<1x8x32xf32>,
    %c0_33 = arith.constant 0 : index
    %c0_34 = arith.constant 0 : index
    %c0_35 = arith.constant 0 : index
    %167 = vector.load %arg14[%c0_33, %c0_34, %c0_35] : memref<2x8x32xf32, #tpu.memory_space<vmem>>, vector<1x8x32xf32>
    %168 = vector.shape_cast %167 : vector<1x8x32xf32> to vector<8x32xf32>
    %169 = vector.shape_cast %161 : vector<8x32xf32> to vector<1x8x32xf32>
    tpu.vector_store %arg14[%c0_33, %c0_34, %c0_35], %169 {strides = array<i32>} : memref<2x8x32xf32, #tpu.memory_space<vmem>>, vector<1x8x32xf32>,
    %170 = tpu.concatenate %30, %49, %68, %87, %106, %125, %144, %163 in 0 : vector<8x32xf32>, vector<8x32xf32>, vector<8x32xf32>, vector<8x32xf32>, vector<8x32xf32>, vector<8x32xf32>, vector<8x32xf32>, vector<8x32xf32> -> vector<64x32xf32>
    %c0_36 = arith.constant 0 : index
    %c0_37 = arith.constant 0 : index
    %171 = vector.load %arg5[%c0_36, %c0_37] : memref<32x128xf32, #tpu.memory_space<vmem>>, vector<32x128xf32>
    %cst_38 = arith.constant dense<0.000000e+00> : vector<64x128xf32>
    %172 = tpu.matmul %170, %171, %cst_38 {dimension_numbers = #tpu.dot_dimension_numbers<[1], [0], [0], [1], [0, 0, 1, 1], [], []>} : vector<64x32xf32>, vector<32x128xf32>, vector<64x128xf32> -> vector<64x128xf32>
    %c0_39 = arith.constant 0 : index
    %c0_40 = arith.constant 0 : index
    %173 = vector.load %arg7[%c0_39, %c0_40] : memref<1x128xf32, #tpu.memory_space<vmem>>, vector<1x128xf32>
    %174 = vector.broadcast %173 : vector<1x128xf32> to vector<64x128xf32>
    %175 = arith.addf %172, %174 : vector<64x128xf32>
    %c0_41 = arith.constant 0 : index
    %c0_42 = arith.constant 0 : index
    %176 = vector.load %arg6[%c0_41, %c0_42] : memref<32x128xf32, #tpu.memory_space<vmem>>, vector<32x128xf32>
    %c1 = arith.constant 1 : index
    %c0_43 = arith.constant 0 : index
    %c0_44 = arith.constant 0 : index
    %177 = vector.load %arg8[%c1, %c0_43, %c0_44] : memref<2x8x32xf32, #tpu.memory_space<vmem>>, vector<1x8x32xf32>
    %178 = vector.shape_cast %177 : vector<1x8x32xf32> to vector<8x32xf32>
    %c1_45 = arith.constant 1 : index
    %c0_46 = arith.constant 0 : index
    %c0_47 = arith.constant 0 : index
    %179 = vector.load %arg9[%c1_45, %c0_46, %c0_47] : memref<2x8x32xf32, #tpu.memory_space<vmem>>, vector<1x8x32xf32>
    %180 = vector.shape_cast %179 : vector<1x8x32xf32> to vector<8x32xf32>
    %181 = vector.extract_strided_slice %175 {offsets = [0, 0], sizes = [8, 128], strides = [1, 1]} : vector<64x128xf32> to vector<8x128xf32>
    %cst_48 = arith.constant dense<0.000000e+00> : vector<8x128xf32>
    %182 = tpu.matmul %178, %176, %cst_48 {dimension_numbers = #tpu.dot_dimension_numbers<[1], [0], [0], [1], [0, 0, 1, 1], [], []>} : vector<8x32xf32>, vector<32x128xf32>, vector<8x128xf32> -> vector<8x128xf32>
    %183 = arith.addf %181, %182 : vector<8x128xf32>
    %184 = vector.extract_strided_slice %183 {offsets = [0, 0], sizes = [8, 96], strides = [1, 1]} : vector<8x128xf32> to vector<8x96xf32>
    %185 = arith.negf %184 : vector<8x96xf32>
    %186 = math.exp %185 : vector<8x96xf32>
    %cst_49 = arith.constant 1.000000e+00 : f32
    %187 = vector.broadcast %cst_49 : f32 to vector<8x96xf32>
    %188 = arith.addf %187, %186 : vector<8x96xf32>
    %189 = arith.divf %187, %188 : vector<8x96xf32>
    %190 = vector.extract_strided_slice %189 {offsets = [0, 0], sizes = [8, 32], strides = [1, 1]} : vector<8x96xf32> to vector<8x32xf32>
    %191 = vector.extract_strided_slice %189 {offsets = [0, 32], sizes = [8, 32], strides = [1, 1]} : vector<8x96xf32> to vector<8x32xf32>
    %192 = vector.extract_strided_slice %189 {offsets = [0, 64], sizes = [8, 32], strides = [1, 1]} : vector<8x96xf32> to vector<8x32xf32>
    %193 = vector.extract_strided_slice %183 {offsets = [0, 96], sizes = [8, 32], strides = [1, 1]} : vector<8x128xf32> to vector<8x32xf32>
    %194 = math.tanh %193 : vector<8x32xf32>
    %195 = arith.mulf %191, %180 : vector<8x32xf32>
    %196 = arith.mulf %190, %194 : vector<8x32xf32>
    %197 = arith.addf %195, %196 : vector<8x32xf32>
    %198 = math.tanh %197 : vector<8x32xf32>
    %199 = arith.mulf %192, %198 : vector<8x32xf32>
    %200 = vector.extract_strided_slice %175 {offsets = [8, 0], sizes = [8, 128], strides = [1, 1]} : vector<64x128xf32> to vector<8x128xf32>
    %cst_50 = arith.constant dense<0.000000e+00> : vector<8x128xf32>
    %201 = tpu.matmul %199, %176, %cst_50 {dimension_numbers = #tpu.dot_dimension_numbers<[1], [0], [0], [1], [0, 0, 1, 1], [], []>} : vector<8x32xf32>, vector<32x128xf32>, vector<8x128xf32> -> vector<8x128xf32>
    %202 = arith.addf %200, %201 : vector<8x128xf32>
    %203 = vector.extract_strided_slice %202 {offsets = [0, 0], sizes = [8, 96], strides = [1, 1]} : vector<8x128xf32> to vector<8x96xf32>
    %204 = arith.negf %203 : vector<8x96xf32>
    %205 = math.exp %204 : vector<8x96xf32>
    %cst_51 = arith.constant 1.000000e+00 : f32
    %206 = vector.broadcast %cst_51 : f32 to vector<8x96xf32>
    %207 = arith.addf %206, %205 : vector<8x96xf32>
    %208 = arith.divf %206, %207 : vector<8x96xf32>
    %209 = vector.extract_strided_slice %208 {offsets = [0, 0], sizes = [8, 32], strides = [1, 1]} : vector<8x96xf32> to vector<8x32xf32>
    %210 = vector.extract_strided_slice %208 {offsets = [0, 32], sizes = [8, 32], strides = [1, 1]} : vector<8x96xf32> to vector<8x32xf32>
    %211 = vector.extract_strided_slice %208 {offsets = [0, 64], sizes = [8, 32], strides = [1, 1]} : vector<8x96xf32> to vector<8x32xf32>
    %212 = vector.extract_strided_slice %202 {offsets = [0, 96], sizes = [8, 32], strides = [1, 1]} : vector<8x128xf32> to vector<8x32xf32>
    %213 = math.tanh %212 : vector<8x32xf32>
    %214 = arith.mulf %210, %197 : vector<8x32xf32>
    %215 = arith.mulf %209, %213 : vector<8x32xf32>
    %216 = arith.addf %214, %215 : vector<8x32xf32>
    %217 = math.tanh %216 : vector<8x32xf32>
    %218 = arith.mulf %211, %217 : vector<8x32xf32>
    %219 = vector.extract_strided_slice %175 {offsets = [16, 0], sizes = [8, 128], strides = [1, 1]} : vector<64x128xf32> to vector<8x128xf32>
    %cst_52 = arith.constant dense<0.000000e+00> : vector<8x128xf32>
    %220 = tpu.matmul %218, %176, %cst_52 {dimension_numbers = #tpu.dot_dimension_numbers<[1], [0], [0], [1], [0, 0, 1, 1], [], []>} : vector<8x32xf32>, vector<32x128xf32>, vector<8x128xf32> -> vector<8x128xf32>
    %221 = arith.addf %219, %220 : vector<8x128xf32>
    %222 = vector.extract_strided_slice %221 {offsets = [0, 0], sizes = [8, 96], strides = [1, 1]} : vector<8x128xf32> to vector<8x96xf32>
    %223 = arith.negf %222 : vector<8x96xf32>
    %224 = math.exp %223 : vector<8x96xf32>
    %cst_53 = arith.constant 1.000000e+00 : f32
    %225 = vector.broadcast %cst_53 : f32 to vector<8x96xf32>
    %226 = arith.addf %225, %224 : vector<8x96xf32>
    %227 = arith.divf %225, %226 : vector<8x96xf32>
    %228 = vector.extract_strided_slice %227 {offsets = [0, 0], sizes = [8, 32], strides = [1, 1]} : vector<8x96xf32> to vector<8x32xf32>
    %229 = vector.extract_strided_slice %227 {offsets = [0, 32], sizes = [8, 32], strides = [1, 1]} : vector<8x96xf32> to vector<8x32xf32>
    %230 = vector.extract_strided_slice %227 {offsets = [0, 64], sizes = [8, 32], strides = [1, 1]} : vector<8x96xf32> to vector<8x32xf32>
    %231 = vector.extract_strided_slice %221 {offsets = [0, 96], sizes = [8, 32], strides = [1, 1]} : vector<8x128xf32> to vector<8x32xf32>
    %232 = math.tanh %231 : vector<8x32xf32>
    %233 = arith.mulf %229, %216 : vector<8x32xf32>
    %234 = arith.mulf %228, %232 : vector<8x32xf32>
    %235 = arith.addf %233, %234 : vector<8x32xf32>
    %236 = math.tanh %235 : vector<8x32xf32>
    %237 = arith.mulf %230, %236 : vector<8x32xf32>
    %238 = vector.extract_strided_slice %175 {offsets = [24, 0], sizes = [8, 128], strides = [1, 1]} : vector<64x128xf32> to vector<8x128xf32>
    %cst_54 = arith.constant dense<0.000000e+00> : vector<8x128xf32>
    %239 = tpu.matmul %237, %176, %cst_54 {dimension_numbers = #tpu.dot_dimension_numbers<[1], [0], [0], [1], [0, 0, 1, 1], [], []>} : vector<8x32xf32>, vector<32x128xf32>, vector<8x128xf32> -> vector<8x128xf32>
    %240 = arith.addf %238, %239 : vector<8x128xf32>
    %241 = vector.extract_strided_slice %240 {offsets = [0, 0], sizes = [8, 96], strides = [1, 1]} : vector<8x128xf32> to vector<8x96xf32>
    %242 = arith.negf %241 : vector<8x96xf32>
    %243 = math.exp %242 : vector<8x96xf32>
    %cst_55 = arith.constant 1.000000e+00 : f32
    %244 = vector.broadcast %cst_55 : f32 to vector<8x96xf32>
    %245 = arith.addf %244, %243 : vector<8x96xf32>
    %246 = arith.divf %244, %245 : vector<8x96xf32>
    %247 = vector.extract_strided_slice %246 {offsets = [0, 0], sizes = [8, 32], strides = [1, 1]} : vector<8x96xf32> to vector<8x32xf32>
    %248 = vector.extract_strided_slice %246 {offsets = [0, 32], sizes = [8, 32], strides = [1, 1]} : vector<8x96xf32> to vector<8x32xf32>
    %249 = vector.extract_strided_slice %246 {offsets = [0, 64], sizes = [8, 32], strides = [1, 1]} : vector<8x96xf32> to vector<8x32xf32>
    %250 = vector.extract_strided_slice %240 {offsets = [0, 96], sizes = [8, 32], strides = [1, 1]} : vector<8x128xf32> to vector<8x32xf32>
    %251 = math.tanh %250 : vector<8x32xf32>
    %252 = arith.mulf %248, %235 : vector<8x32xf32>
    %253 = arith.mulf %247, %251 : vector<8x32xf32>
    %254 = arith.addf %252, %253 : vector<8x32xf32>
    %255 = math.tanh %254 : vector<8x32xf32>
    %256 = arith.mulf %249, %255 : vector<8x32xf32>
    %257 = vector.extract_strided_slice %175 {offsets = [32, 0], sizes = [8, 128], strides = [1, 1]} : vector<64x128xf32> to vector<8x128xf32>
    %cst_56 = arith.constant dense<0.000000e+00> : vector<8x128xf32>
    %258 = tpu.matmul %256, %176, %cst_56 {dimension_numbers = #tpu.dot_dimension_numbers<[1], [0], [0], [1], [0, 0, 1, 1], [], []>} : vector<8x32xf32>, vector<32x128xf32>, vector<8x128xf32> -> vector<8x128xf32>
    %259 = arith.addf %257, %258 : vector<8x128xf32>
    %260 = vector.extract_strided_slice %259 {offsets = [0, 0], sizes = [8, 96], strides = [1, 1]} : vector<8x128xf32> to vector<8x96xf32>
    %261 = arith.negf %260 : vector<8x96xf32>
    %262 = math.exp %261 : vector<8x96xf32>
    %cst_57 = arith.constant 1.000000e+00 : f32
    %263 = vector.broadcast %cst_57 : f32 to vector<8x96xf32>
    %264 = arith.addf %263, %262 : vector<8x96xf32>
    %265 = arith.divf %263, %264 : vector<8x96xf32>
    %266 = vector.extract_strided_slice %265 {offsets = [0, 0], sizes = [8, 32], strides = [1, 1]} : vector<8x96xf32> to vector<8x32xf32>
    %267 = vector.extract_strided_slice %265 {offsets = [0, 32], sizes = [8, 32], strides = [1, 1]} : vector<8x96xf32> to vector<8x32xf32>
    %268 = vector.extract_strided_slice %265 {offsets = [0, 64], sizes = [8, 32], strides = [1, 1]} : vector<8x96xf32> to vector<8x32xf32>
    %269 = vector.extract_strided_slice %259 {offsets = [0, 96], sizes = [8, 32], strides = [1, 1]} : vector<8x128xf32> to vector<8x32xf32>
    %270 = math.tanh %269 : vector<8x32xf32>
    %271 = arith.mulf %267, %254 : vector<8x32xf32>
    %272 = arith.mulf %266, %270 : vector<8x32xf32>
    %273 = arith.addf %271, %272 : vector<8x32xf32>
    %274 = math.tanh %273 : vector<8x32xf32>
    %275 = arith.mulf %268, %274 : vector<8x32xf32>
    %276 = vector.extract_strided_slice %175 {offsets = [40, 0], sizes = [8, 128], strides = [1, 1]} : vector<64x128xf32> to vector<8x128xf32>
    %cst_58 = arith.constant dense<0.000000e+00> : vector<8x128xf32>
    %277 = tpu.matmul %275, %176, %cst_58 {dimension_numbers = #tpu.dot_dimension_numbers<[1], [0], [0], [1], [0, 0, 1, 1], [], []>} : vector<8x32xf32>, vector<32x128xf32>, vector<8x128xf32> -> vector<8x128xf32>
    %278 = arith.addf %276, %277 : vector<8x128xf32>
    %279 = vector.extract_strided_slice %278 {offsets = [0, 0], sizes = [8, 96], strides = [1, 1]} : vector<8x128xf32> to vector<8x96xf32>
    %280 = arith.negf %279 : vector<8x96xf32>
    %281 = math.exp %280 : vector<8x96xf32>
    %cst_59 = arith.constant 1.000000e+00 : f32
    %282 = vector.broadcast %cst_59 : f32 to vector<8x96xf32>
    %283 = arith.addf %282, %281 : vector<8x96xf32>
    %284 = arith.divf %282, %283 : vector<8x96xf32>
    %285 = vector.extract_strided_slice %284 {offsets = [0, 0], sizes = [8, 32], strides = [1, 1]} : vector<8x96xf32> to vector<8x32xf32>
    %286 = vector.extract_strided_slice %284 {offsets = [0, 32], sizes = [8, 32], strides = [1, 1]} : vector<8x96xf32> to vector<8x32xf32>
    %287 = vector.extract_strided_slice %284 {offsets = [0, 64], sizes = [8, 32], strides = [1, 1]} : vector<8x96xf32> to vector<8x32xf32>
    %288 = vector.extract_strided_slice %278 {offsets = [0, 96], sizes = [8, 32], strides = [1, 1]} : vector<8x128xf32> to vector<8x32xf32>
    %289 = math.tanh %288 : vector<8x32xf32>
    %290 = arith.mulf %286, %273 : vector<8x32xf32>
    %291 = arith.mulf %285, %289 : vector<8x32xf32>
    %292 = arith.addf %290, %291 : vector<8x32xf32>
    %293 = math.tanh %292 : vector<8x32xf32>
    %294 = arith.mulf %287, %293 : vector<8x32xf32>
    %295 = vector.extract_strided_slice %175 {offsets = [48, 0], sizes = [8, 128], strides = [1, 1]} : vector<64x128xf32> to vector<8x128xf32>
    %cst_60 = arith.constant dense<0.000000e+00> : vector<8x128xf32>
    %296 = tpu.matmul %294, %176, %cst_60 {dimension_numbers = #tpu.dot_dimension_numbers<[1], [0], [0], [1], [0, 0, 1, 1], [], []>} : vector<8x32xf32>, vector<32x128xf32>, vector<8x128xf32> -> vector<8x128xf32>
    %297 = arith.addf %295, %296 : vector<8x128xf32>
    %298 = vector.extract_strided_slice %297 {offsets = [0, 0], sizes = [8, 96], strides = [1, 1]} : vector<8x128xf32> to vector<8x96xf32>
    %299 = arith.negf %298 : vector<8x96xf32>
    %300 = math.exp %299 : vector<8x96xf32>
    %cst_61 = arith.constant 1.000000e+00 : f32
    %301 = vector.broadcast %cst_61 : f32 to vector<8x96xf32>
    %302 = arith.addf %301, %300 : vector<8x96xf32>
    %303 = arith.divf %301, %302 : vector<8x96xf32>
    %304 = vector.extract_strided_slice %303 {offsets = [0, 0], sizes = [8, 32], strides = [1, 1]} : vector<8x96xf32> to vector<8x32xf32>
    %305 = vector.extract_strided_slice %303 {offsets = [0, 32], sizes = [8, 32], strides = [1, 1]} : vector<8x96xf32> to vector<8x32xf32>
    %306 = vector.extract_strided_slice %303 {offsets = [0, 64], sizes = [8, 32], strides = [1, 1]} : vector<8x96xf32> to vector<8x32xf32>
    %307 = vector.extract_strided_slice %297 {offsets = [0, 96], sizes = [8, 32], strides = [1, 1]} : vector<8x128xf32> to vector<8x32xf32>
    %308 = math.tanh %307 : vector<8x32xf32>
    %309 = arith.mulf %305, %292 : vector<8x32xf32>
    %310 = arith.mulf %304, %308 : vector<8x32xf32>
    %311 = arith.addf %309, %310 : vector<8x32xf32>
    %312 = math.tanh %311 : vector<8x32xf32>
    %313 = arith.mulf %306, %312 : vector<8x32xf32>
    %314 = vector.extract_strided_slice %175 {offsets = [56, 0], sizes = [8, 128], strides = [1, 1]} : vector<64x128xf32> to vector<8x128xf32>
    %cst_62 = arith.constant dense<0.000000e+00> : vector<8x128xf32>
    %315 = tpu.matmul %313, %176, %cst_62 {dimension_numbers = #tpu.dot_dimension_numbers<[1], [0], [0], [1], [0, 0, 1, 1], [], []>} : vector<8x32xf32>, vector<32x128xf32>, vector<8x128xf32> -> vector<8x128xf32>
    %316 = arith.addf %314, %315 : vector<8x128xf32>
    %317 = vector.extract_strided_slice %316 {offsets = [0, 0], sizes = [8, 96], strides = [1, 1]} : vector<8x128xf32> to vector<8x96xf32>
    %318 = arith.negf %317 : vector<8x96xf32>
    %319 = math.exp %318 : vector<8x96xf32>
    %cst_63 = arith.constant 1.000000e+00 : f32
    %320 = vector.broadcast %cst_63 : f32 to vector<8x96xf32>
    %321 = arith.addf %320, %319 : vector<8x96xf32>
    %322 = arith.divf %320, %321 : vector<8x96xf32>
    %323 = vector.extract_strided_slice %322 {offsets = [0, 0], sizes = [8, 32], strides = [1, 1]} : vector<8x96xf32> to vector<8x32xf32>
    %324 = vector.extract_strided_slice %322 {offsets = [0, 32], sizes = [8, 32], strides = [1, 1]} : vector<8x96xf32> to vector<8x32xf32>
    %325 = vector.extract_strided_slice %322 {offsets = [0, 64], sizes = [8, 32], strides = [1, 1]} : vector<8x96xf32> to vector<8x32xf32>
    %326 = vector.extract_strided_slice %316 {offsets = [0, 96], sizes = [8, 32], strides = [1, 1]} : vector<8x128xf32> to vector<8x32xf32>
    %327 = math.tanh %326 : vector<8x32xf32>
    %328 = arith.mulf %324, %311 : vector<8x32xf32>
    %329 = arith.mulf %323, %327 : vector<8x32xf32>
    %330 = arith.addf %328, %329 : vector<8x32xf32>
    %331 = math.tanh %330 : vector<8x32xf32>
    %332 = arith.mulf %325, %331 : vector<8x32xf32>
    %c1_64 = arith.constant 1 : index
    %c0_65 = arith.constant 0 : index
    %c0_66 = arith.constant 0 : index
    %333 = vector.load %arg13[%c1_64, %c0_65, %c0_66] : memref<2x8x32xf32, #tpu.memory_space<vmem>>, vector<1x8x32xf32>
    %334 = vector.shape_cast %333 : vector<1x8x32xf32> to vector<8x32xf32>
    %335 = vector.shape_cast %332 : vector<8x32xf32> to vector<1x8x32xf32>
    tpu.vector_store %arg13[%c1_64, %c0_65, %c0_66], %335 {strides = array<i32>} : memref<2x8x32xf32, #tpu.memory_space<vmem>>, vector<1x8x32xf32>,
    %c1_67 = arith.constant 1 : index
    %c0_68 = arith.constant 0 : index
    %c0_69 = arith.constant 0 : index
    %336 = vector.load %arg14[%c1_67, %c0_68, %c0_69] : memref<2x8x32xf32, #tpu.memory_space<vmem>>, vector<1x8x32xf32>
    %337 = vector.shape_cast %336 : vector<1x8x32xf32> to vector<8x32xf32>
    %338 = vector.shape_cast %330 : vector<8x32xf32> to vector<1x8x32xf32>
    tpu.vector_store %arg14[%c1_67, %c0_68, %c0_69], %338 {strides = array<i32>} : memref<2x8x32xf32, #tpu.memory_space<vmem>>, vector<1x8x32xf32>,
    %c0_70 = arith.constant 0 : index
    %c0_71 = arith.constant 0 : index
    %339 = vector.load %arg10[%c0_70, %c0_71] : memref<32x1xf32, #tpu.memory_space<vmem>>, vector<32x1xf32>
    %cst_72 = arith.constant dense<0.000000e+00> : vector<8x1xf32>
    %340 = tpu.matmul %332, %339, %cst_72 {dimension_numbers = #tpu.dot_dimension_numbers<[1], [0], [0], [1], [0, 0, 1, 1], [], []>} : vector<8x32xf32>, vector<32x1xf32>, vector<8x1xf32> -> vector<8x1xf32>
    %c0_73 = arith.constant 0 : index
    %c0_74 = arith.constant 0 : index
    %341 = vector.load %arg11[%c0_73, %c0_74] : memref<1x1xf32, #tpu.memory_space<vmem>>, vector<1x1xf32>
    %342 = vector.broadcast %341 : vector<1x1xf32> to vector<8x1xf32>
    %343 = arith.addf %340, %342 : vector<8x1xf32>
    %344 = arith.negf %343 : vector<8x1xf32>
    %345 = math.exp %344 : vector<8x1xf32>
    %cst_75 = arith.constant 1.000000e+00 : f32
    %346 = vector.broadcast %cst_75 : f32 to vector<8x1xf32>
    %347 = arith.addf %346, %345 : vector<8x1xf32>
    %348 = arith.divf %346, %347 : vector<8x1xf32>
    %c0_76 = arith.constant 0 : index
    %c0_77 = arith.constant 0 : index
    %349 = vector.load %arg12[%c0_76, %c0_77] : memref<8x1xf32, #tpu.memory_space<vmem>>, vector<8x1xf32>
    tpu.vector_store %arg12[%c0_76, %c0_77], %348 {strides = array<i32>} : memref<8x1xf32, #tpu.memory_space<vmem>>, vector<8x1xf32>,
    return
  }
  func.func @transform_0(%arg0: i32) -> (i32, i32, i32) {
    %c0_i32 = arith.constant 0 : i32
    %c0_i32_0 = arith.constant 0 : i32
    %c0_i32_1 = arith.constant 0 : i32
    return %c0_i32, %arg0, %c0_i32_0 : i32, i32, i32
  }
  func.func @transform_1(%arg0: i32) -> (i32, i32) {
    %c0_i32 = arith.constant 0 : i32
    %c0_i32_0 = arith.constant 0 : i32
    %c0_i32_1 = arith.constant 0 : i32
    return %c0_i32, %c0_i32_0 : i32, i32
  }
  func.func @transform_2(%arg0: i32) -> (i32, i32) {
    %c0_i32 = arith.constant 0 : i32
    %c0_i32_0 = arith.constant 0 : i32
    %c0_i32_1 = arith.constant 0 : i32
    return %c0_i32, %c0_i32_0 : i32, i32
  }
  func.func @transform_3(%arg0: i32) -> (i32, i32) {
    %c0_i32 = arith.constant 0 : i32
    %c0_i32_0 = arith.constant 0 : i32
    %c0_i32_1 = arith.constant 0 : i32
    return %c0_i32, %c0_i32_0 : i32, i32
  }
  func.func @transform_4(%arg0: i32) -> (i32, i32) {
    %c0_i32 = arith.constant 0 : i32
    %c0_i32_0 = arith.constant 0 : i32
    %c0_i32_1 = arith.constant 0 : i32
    return %c0_i32, %c0_i32_0 : i32, i32
  }
  func.func @transform_5(%arg0: i32) -> (i32, i32) {
    %c0_i32 = arith.constant 0 : i32
    %c0_i32_0 = arith.constant 0 : i32
    %c0_i32_1 = arith.constant 0 : i32
    return %c0_i32, %c0_i32_0 : i32, i32
  }
  func.func @transform_6(%arg0: i32) -> (i32, i32) {
    %c0_i32 = arith.constant 0 : i32
    %c0_i32_0 = arith.constant 0 : i32
    %c0_i32_1 = arith.constant 0 : i32
    return %c0_i32, %c0_i32_0 : i32, i32
  }
  func.func @transform_7(%arg0: i32) -> (i32, i32, i32) {
    %c0_i32 = arith.constant 0 : i32
    %c0_i32_0 = arith.constant 0 : i32
    %c0_i32_1 = arith.constant 0 : i32
    return %c0_i32, %arg0, %c0_i32_0 : i32, i32, i32
  }
  func.func @transform_8(%arg0: i32) -> (i32, i32, i32) {
    %c0_i32 = arith.constant 0 : i32
    %c0_i32_0 = arith.constant 0 : i32
    %c0_i32_1 = arith.constant 0 : i32
    return %c0_i32, %arg0, %c0_i32_0 : i32, i32, i32
  }
  func.func @transform_9(%arg0: i32) -> (i32, i32) {
    %c0_i32 = arith.constant 0 : i32
    %c0_i32_0 = arith.constant 0 : i32
    %c0_i32_1 = arith.constant 0 : i32
    return %c0_i32, %c0_i32_0 : i32, i32
  }
  func.func @transform_10(%arg0: i32) -> (i32, i32) {
    %c0_i32 = arith.constant 0 : i32
    %c0_i32_0 = arith.constant 0 : i32
    %c0_i32_1 = arith.constant 0 : i32
    return %c0_i32, %c0_i32_0 : i32, i32
  }
  func.func @transform_11(%arg0: i32) -> (i32, i32) {
    %c0_i32 = arith.constant 0 : i32
    %c0_i32_0 = arith.constant 0 : i32
    return %arg0, %c0_i32 : i32, i32
  }
  func.func @transform_12(%arg0: i32) -> (i32, i32, i32) {
    %c0_i32 = arith.constant 0 : i32
    %c0_i32_0 = arith.constant 0 : i32
    %c0_i32_1 = arith.constant 0 : i32
    return %c0_i32, %arg0, %c0_i32_0 : i32, i32, i32
  }
  func.func @transform_13(%arg0: i32) -> (i32, i32, i32) {
    %c0_i32 = arith.constant 0 : i32
    %c0_i32_0 = arith.constant 0 : i32
    %c0_i32_1 = arith.constant 0 : i32
    return %c0_i32, %arg0, %c0_i32_0 : i32, i32, i32
  }
}

</mosaic_0001>

<bundles_post_ra>
// kernel: sentimental_lstm_forward.1
= control target key start
LH: loop header
LB: loop body
LE: loop exit
PB: predicated region body
PF: predicated region fallthrough
CT: control target
= control target key end

     0   :  { %v2583_v2 = vmov 0.0   ;;  %vm2584_vm0 = vmmov 0   ;;  %vm62_vm1 = vcmask 261120   ;;  %s2585_s30 = smov 32   ;;  %vm2039_vm2 = vcmask 7168   ;;  %s3134_s1 = inlined_call_operand.vmem [shape: f32[32,128], index: 1, kind: input, shape index: {}]   ;;  %s3135_s2 = inlined_call_operand.vmem [shape: f32[32,128], index: 2, kind: input, shape index: {}]   ;;  %s3136_s0 = inlined_call_operand.vmem [shape: f32[8,8,32], index: 0, kind: input, shape index: {}]   ;;  %s3137_s7 = inlined_call_operand.vmem [shape: f32[2,8,32], index: 7, kind: input, shape index: {}]   ;;  %s3138_s3 = inlined_call_operand.vmem [shape: f32[1,128], index: 3, kind: input, shape index: {}]   ;;  %s3139_s8 = inlined_call_operand.vmem [shape: f32[2,8,32], index: 8, kind: input, shape index: {}]   ;;  %s3140_s4 = inlined_call_operand.vmem [shape: f32[32,128], index: 4, kind: input, shape index: {}]   ;;  %s3141_s5 = inlined_call_operand.vmem [shape: f32[32,128], index: 5, kind: input, shape index: {}]   ;;  %s3142_s6 = inlined_call_operand.vmem [shape: f32[1,128], index: 6, kind: input, shape index: {}]   ;;  %s3143_s12 = inlined_call_operand.vmem [shape: f32[2,8,32], index: 12, kind: output, shape index: {1}]   ;;  %s3144_s9 = inlined_call_operand.vmem [shape: f32[32,1], index: 9, kind: input, shape index: {}]   ;;  %s3145_s10 = inlined_call_operand.<no memory space> [shape: f32[1,1], index: 10, kind: input, shape index: {}]   ;;  %s3146_s13 = inlined_call_operand.vmem [shape: f32[2,8,32], index: 13, kind: output, shape index: {2}]   ;;  %s3147_s11 = inlined_call_operand.vmem [shape: f32[8,1], index: 11, kind: output, shape index: {0}]  }
   0x1   :  { %v54_v0 = vld [vmem:[%s3134_s1 + $0x18] sm:$0xff]  ;;  %v53_v1 = vld [vmem:[%s3134_s1 + $0x10] sm:$0xff]  ;;  %2239 = vmatprep.subr.mxu1 %v2583_v2  ;;  %2247 = vmatprep.mubr.msk.f32.mxu1 %vm2584_vm0, %v2583_v2  ;;  %v52_v5 = vld [vmem:[%s3134_s1 + $0x8] sm:$0xff] }
   0x2   :  { %v2668_v3 = vld [vmem:[%s3135_s2 + $0x18] sm:$0xff]  ;;  %2219 = vmatprep.subr.mxu0 %v54_v0  ;;  %v2676_v4 = vld [vmem:[%s3135_s2 + $0x10] sm:$0xff]  ;;  %v43_v6 = vld [vmem:[%s3136_s0] sm:$0xff] }
   0x3   :  { %2240 = vmatpush3.msra.mxu1 %v2668_v3  ;;  %2220 = vmatpush3.msra.mxu0 %v54_v0  ;;  %v2689_v7 = vld [vmem:[%s3135_s2 + $0x8] sm:$0xff]  ;;  %v51_v8 = vld [vmem:[%s3134_s1] sm:$0xff]  ;;  %v45_v49 = vld [vmem:[%s3136_s0 + $0x10] sm:$0xff] }
   0x4   :  { %2241 = vmatprep.subr.mxu1 %v2583_v2  ;;  %2221 = vmatprep.subr.mxu0 %v53_v1  ;;  %v2699_v9 = vld [vmem:[%s3135_s2] sm:$0xff]  ;;  %v44_v10 = vld [vmem:[%s3136_s0 + $0x8] sm:$0xff]  ;;  %v46_v50 = vld [vmem:[%s3136_s0 + $0x18] sm:$0xff] }
   0x5   :  { %2242 = vmatpush3.msra.mxu1 %v2676_v4  ;;  %2222 = vmatpush3.msra.mxu0 %v53_v1  ;;  %v196_v11 = vld [vmem:[%s3137_s7] sm:$0xff]  ;;  %v48_v52 = vld [vmem:[%s3136_s0 + $0x28] sm:$0xff]  ;;  %v49_v53 = vld [vmem:[%s3136_s0 + $0x30] sm:$0xff] }
   0x6   :  { %2243 = vmatprep.subr.mxu1 %v2583_v2  ;;  %2223 = vmatprep.subr.mxu0 %v52_v5  ;;  %v2735_v14 = vld [vmem:[%s3138_s3] ss:$0 sm:$0xff]  ;;  %s2586_s3 = smov 64   ;;  %v50_v54 = vld [vmem:[%s3136_s0 + $0x38] sm:$0xff] }
   0x7   :  { %2227 = vmatprep.mubr.msk.f32.mxu0 %vm62_vm1, %v43_v6  ;;  %2224 = vmatpush3.msra.mxu0 %v52_v5  ;;  %v197_v20 = vld [vmem:[%s3139_s8] sm:$0xff] }
   0x8   :  { %2244 = vmatpush3.msra.mxu1 %v2689_v7  ;;  %2225 = vmatprep.subr.mxu0 %v51_v8  ;;  %v47_v51 = vld [vmem:[%s3136_s0 + $0x20] sm:$0xff] }
   0x9   :  { %2245 = vmatprep.subr.mxu1 %v2583_v2  ;;  %2226 = vmatpush3.msra.mxu0 %v51_v8 }
   0xa   :  { %2246 = vmatpush3.msra.mxu1 %v2699_v9  ;;  %2228 = vmatmul.mubr.msk.f32.vlgmr.msra.gmra.mxu0 %vm62_vm1, %v44_v10 }
   0xb   :  { %2248 = vmatmul.mubr.msk.f32.vlgmr.msra.gmra.mxu1 %vm62_vm1, %v196_v11  ;;  %2250 = vmatprep.subr.mxu1 %v2583_v2 }
   0xc   :  { %2258 = vmatprep.mubr.msk.f32.mxu1 %vm2584_vm0, %v2583_v2  ;;  %2251 = vmatpush3.msra.mxu1 %v2668_v3 }
   0xd   :  { %2261 = vmatprep.subr.mxu0 %v2583_v2  ;;  %2252 = vmatprep.subr.mxu1 %v2583_v2 }
   0xe   :  { %2262 = vmatpush3.msra.mxu0 %v2668_v3  ;;  %2253 = vmatpush3.msra.mxu1 %v2676_v4 }
   0xf   :  { %2263 = vmatprep.subr.mxu0 %v2583_v2  ;;  %2254 = vmatprep.subr.mxu1 %v2583_v2 }
  0x10   :  { %2264 = vmatpush3.msra.mxu0 %v2676_v4  ;;  %2255 = vmatpush3.msra.mxu1 %v2689_v7 }
  0x11   :  { %2265 = vmatprep.subr.mxu0 %v2583_v2  ;;  %2256 = vmatprep.subr.mxu1 %v2583_v2 }
  0x12   :  { %2266 = vmatpush3.msra.mxu0 %v2689_v7  ;;  %2257 = vmatpush3.msra.mxu1 %v2699_v9 }
  0x13   :  { %2267 = vmatprep.subr.mxu0 %v2583_v2  ;;  %2272 = vmatprep.subr.mxu1 %v2583_v2 }
  0x14   :  { %2268 = vmatpush3.msra.mxu0 %v2699_v9  ;;  %2230 = vmatprep.mubr.msk.f32.mxu0 %vm62_vm1, %v45_v49 }
  0x15   :  { %2283 = vmatprep.subr.mxu0 %v2583_v2  ;;  %2231 = vmatmul.mubr.msk.f32.gmra.mxu0 %vm62_vm1, %v46_v50 }
  0x16   :  { %2233 = vmatprep.mubr.msk.f32.mxu0 %vm62_vm1, %v47_v51 }
  0x19   :  { %2234 = vmatmul.mubr.msk.f32.gmra.mxu0 %vm62_vm1, %v48_v52 }
  0x1a   :  { %2236 = vmatprep.mubr.msk.f32.mxu0 %vm62_vm1, %v49_v53 }
  0x1d   :  { %2237 = vmatmul.mubr.msk.f32.gmra.mxu0 %vm62_vm1, %v50_v54 }
  0x1e   :  { %2269 = vmatprep.mubr.msk.f32.mxu0 %vm2584_vm0, %v2583_v2 }
  0xca   :  { %v2229_v12 = vpop.f32.mrf.mxu0 }
  0xcb   :  { %v267_v13 = vpop.f32.mrf.mxu1  ;;  %v159_v35 = vadd.f32 %v2229_v12, %v2735_v14 }
  0xcc   :  { %v153_v15 = vpop.f32.mrf.mxu0 }
  0xcd   :  { %v2249_v16 = vpop.f32.mrf.mxu1  ;;  %v154_v17 = vadd.f32 %v2735_v14, %v153_v15 }
  0xcf   :  { %v271_v18 = vadd.f32 %v267_v13, %v154_v17 }
  0xd1   :  { %2451 = vtanh.f32 %v271_v18  ;;  %v2063_v21 = vmul.f32 -1.442695, %v271_v18 }
  0xd3   :  { %2453 = vpow2.f32 %v2063_v21 }
  0xd5   :  { %v2232_v59 = vpop.f32.mrf.mxu0 }
  0xd7   :  { %v163_v60 = vpop.f32.mrf.mxu0 }
  0xd8   :  { %v164_v1 = vadd.f32 %v2735_v14, %v163_v60 }
  0xd9   :  { %v2805_v61 = vpop.f32.mrf.mxu0 }
  0xdb   :  { %v2807_v62 = vpop.f32.mrf.mxu0 }
  0xdd   :  { %v2809_v63 = vpop.f32.mrf.mxu0 }
  0xde   :  { %v2452_v19 = vpop.eup %2451 }
  0xdf   :  { %285 = vrot.lane.b32.xlu0 %v2452_v19, %s2585_s30  ;;  %v2811_v0 = vpop.f32.mrf.mxu0 }
  0xe0   :  { %v2454_v22 = vpop.eup %2453 }
  0xe1   :  { %v275_v23 = vadd.f32 1.0, %v2454_v22 }
  0xe3   :  { %280 = vrot.lane.b32.xlu0 %v197_v20, %s2585_s30  ;;  %2455 = vrcp.f32 %v275_v23 }
  0xf0   :  { %v2456_v24 = vpop.eup %2455 }
 0x151   :  { %v286_v25 = vpop.permute.xlu0 %285 }
 0x152   :  { %v288_v26 = vmul.f32 %v2456_v24, %v286_v25  ;;  %v169_v25 = vadd.f32 %v2232_v59, %v2735_v14 }
 0x154   :  { %290 = vrot.lane.b32.xlu1 %v288_v26, %s2585_s30 }
 0x155   :  { %v281_v27 = vpop.permute.xlu0 %280 }
 0x156   :  { %v283_v28 = vmul.f32 %v2456_v24, %v281_v27 }
 0x1c6   :  { %v291_v29 = vpop.permute.xlu1 %290 }
 0x1c7   :  { %v293_v30 = vadd.f32 %v291_v29, %v283_v28 }
 0x1c9   :  { %2457 = vtanh.f32 %v293_v30 }
 0x1d6   :  { %v2458_v31 = vpop.eup %2457 }
 0x1d7   :  { %296 = vrot.lane.b32.xlu1 %v2458_v31, %s2585_s30 }
 0x249   :  { %v297_v32 = vpop.permute.xlu1 %296 }
 0x24a   :  { %v299_v33 = vmul.f32 %v2456_v24, %v297_v32 }
 0x24c   :  { %301 = vrot.lane.b32.xlu0 %v299_v33, %s2586_s3 }
 0x2be   :  { %v2746_v34 = vpop.permute.xlu0 %301 }
 0x2bf   :  { %2259 = vmatmul.mubr.msk.f32.vlgmr.msra.gmra.mxu1 %vm62_vm1, %v2746_v34 }
 0x2c0   :  { %2273 = vmatpush3.msra.mxu1 %v2668_v3  ;;  %2280 = vmatprep.mubr.msk.f32.mxu1 %vm2584_vm0, %v2583_v2 }
 0x2c1   :  { %2274 = vmatprep.subr.mxu1 %v2583_v2 }
 0x2c2   :  { %2275 = vmatpush3.msra.mxu1 %v2676_v4 }
 0x2c3   :  { %2276 = vmatprep.subr.mxu1 %v2583_v2 }
 0x2c4   :  { %2277 = vmatpush3.msra.mxu1 %v2689_v7 }
 0x2c5   :  { %2278 = vmatprep.subr.mxu1 %v2583_v2 }
 0x2c6   :  { %2279 = vmatpush3.msra.mxu1 %v2699_v9 }
 0x2c7   :  { %2294 = vmatprep.subr.mxu1 %v2583_v2 }
 0x37f   :  { %v371_v36 = vpop.f32.mrf.mxu1 }
 0x380   :  { %v375_v37 = vadd.f32 %v371_v36, %v159_v35 }
 0x381   :  { %v2260_v38 = vpop.f32.mrf.mxu1 }
 0x382   :  { %2459 = vtanh.f32 %v375_v37  ;;  %v2065_v40 = vmul.f32 -1.442695, %v375_v37 }
 0x384   :  { %2461 = vpow2.f32 %v2065_v40 }
 0x38f   :  { %v2460_v39 = vpop.eup %2459 }
 0x390   :  { %385 = vrot.lane.b32.xlu1 %v2460_v39, %s2585_s30 }
 0x391   :  { %v2462_v41 = vpop.eup %2461 }
 0x392   :  { %v379_v42 = vadd.f32 1.0, %v2462_v41 }
 0x394   :  { %2463 = vrcp.f32 %v379_v42 }
 0x3a1   :  { %v2464_v43 = vpop.eup %2463 }
 0x3a2   :  { %v383_v46 = vmul.f32 %v2464_v43, %v293_v30 }
 0x402   :  { %v386_v44 = vpop.permute.xlu1 %385 }
 0x403   :  { %v388_v45 = vmul.f32 %v2464_v43, %v386_v44  ;;  %v174_v44 = vadd.f32 %v2735_v14, %v2807_v62 }
 0x405   :  { %390 = vrot.lane.b32.xlu0 %v388_v45, %s2585_s30 }
 0x477   :  { %v391_v47 = vpop.permute.xlu0 %390 }
 0x478   :  { %v393_v48 = vadd.f32 %v391_v47, %v383_v46 }
 0x47a   :  { %2465 = vtanh.f32 %v393_v48 }
 0x487   :  { %v2466_v55 = vpop.eup %2465 }
 0x488   :  { %396 = vrot.lane.b32.xlu1 %v2466_v55, %s2585_s30 }
 0x4fa   :  { %v397_v56 = vpop.permute.xlu1 %396 }
 0x4fb   :  { %v399_v57 = vmul.f32 %v2464_v43, %v397_v56 }
 0x4fd   :  { %401 = vrot.lane.b32.xlu0 %v399_v57, %s2586_s3 }
 0x56f   :  { %v2791_v58 = vpop.permute.xlu0 %401 }
 0x570   :  { %2270 = vmatmul.mubr.msk.f32.vlgmr.msra.gmra.mxu0 %vm62_vm1, %v2791_v58 }
 0x571   :  { %2284 = vmatpush3.msra.mxu0 %v2668_v3  ;;  %2291 = vmatprep.mubr.msk.f32.mxu0 %vm2584_vm0, %v2583_v2 }
 0x572   :  { %2285 = vmatprep.subr.mxu0 %v2583_v2 }
 0x573   :  { %2286 = vmatpush3.msra.mxu0 %v2676_v4 }
 0x574   :  { %2287 = vmatprep.subr.mxu0 %v2583_v2 }
 0x575   :  { %2288 = vmatpush3.msra.mxu0 %v2689_v7 }
 0x576   :  { %2289 = vmatprep.subr.mxu0 %v2583_v2 }
 0x577   :  { %2290 = vmatpush3.msra.mxu0 %v2699_v9 }
 0x578   :  { %2305 = vmatprep.subr.mxu0 %v2583_v2 }
 0x630   :  { %v471_v5 = vpop.f32.mrf.mxu0 }
 0x631   :  { %v475_v6 = vadd.f32 %v471_v5, %v164_v1 }
 0x632   :  { %v2271_v8 = vpop.f32.mrf.mxu0 }
 0x633   :  { %2467 = vtanh.f32 %v475_v6  ;;  %v2067_v11 = vmul.f32 -1.442695, %v475_v6 }
 0x635   :  { %2469 = vpow2.f32 %v2067_v11 }
 0x640   :  { %v2468_v10 = vpop.eup %2467 }
 0x641   :  { %485 = vrot.lane.b32.xlu1 %v2468_v10, %s2585_s30 }
 0x642   :  { %v2470_v12 = vpop.eup %2469 }
 0x643   :  { %v479_v13 = vadd.f32 1.0, %v2470_v12 }
 0x645   :  { %2471 = vrcp.f32 %v479_v13 }
 0x652   :  { %v2472_v15 = vpop.eup %2471 }
 0x653   :  { %v483_v18 = vmul.f32 %v2472_v15, %v393_v48 }
 0x6b3   :  { %v486_v16 = vpop.permute.xlu1 %485 }
 0x6b4   :  { %v488_v17 = vmul.f32 %v2472_v15, %v486_v16 }
 0x6b6   :  { %490 = vrot.lane.b32.xlu0 %v488_v17, %s2585_s30  ;;  %v1013_v17 = vld [vmem:[%s3140_s4 + $0x18] sm:$0xff] }
 0x728   :  { %v491_v19 = vpop.permute.xlu0 %490 }
 0x729   :  { %v493_v20 = vadd.f32 %v491_v19, %v483_v18 }
 0x72b   :  { %2473 = vtanh.f32 %v493_v20 }
 0x738   :  { %v2474_v21 = vpop.eup %2473 }
 0x739   :  { %496 = vrot.lane.b32.xlu1 %v2474_v21, %s2585_s30 }
 0x7ab   :  { %v497_v22 = vpop.permute.xlu1 %496 }
 0x7ac   :  { %v499_v23 = vmul.f32 %v2472_v15, %v497_v22  ;;  %v1012_v22 = vld [vmem:[%s3140_s4 + $0x10] sm:$0xff] }
 0x7ae   :  { %501 = vrot.lane.b32.xlu0 %v499_v23, %s2586_s3  ;;  %v1011_v23 = vld [vmem:[%s3140_s4 + $0x8] sm:$0xff] }
 0x820   :  { %v2818_v24 = vpop.permute.xlu0 %501 }
 0x821   :  { %2281 = vmatmul.mubr.msk.f32.vlgmr.msra.gmra.mxu1 %vm62_vm1, %v2818_v24 }
 0x822   :  { %2295 = vmatpush3.msra.mxu1 %v2668_v3  ;;  %2302 = vmatprep.mubr.msk.f32.mxu1 %vm2584_vm0, %v2583_v2 }
 0x823   :  { %2296 = vmatprep.subr.mxu1 %v2583_v2 }
 0x824   :  { %2297 = vmatpush3.msra.mxu1 %v2676_v4 }
 0x825   :  { %2298 = vmatprep.subr.mxu1 %v2583_v2 }
 0x826   :  { %2299 = vmatpush3.msra.mxu1 %v2689_v7 }
 0x827   :  { %2300 = vmatprep.subr.mxu1 %v2583_v2 }
 0x828   :  { %2301 = vmatpush3.msra.mxu1 %v2699_v9 }
 0x829   :  { %2316 = vmatprep.subr.mxu1 %v2583_v2 }
 0x8e1   :  { %v571_v26 = vpop.f32.mrf.mxu1 }
 0x8e2   :  { %v575_v27 = vadd.f32 %v571_v26, %v169_v25  ;;  %v1010_v25 = vld [vmem:[%s3140_s4] sm:$0xff]  ;;  %s2587_s4 = smov 96  }
 0x8e3   :  { %v2282_v28 = vpop.f32.mrf.mxu1 }
 0x8e4   :  { %2475 = vtanh.f32 %v575_v27  ;;  %v2069_v30 = vmul.f32 -1.442695, %v575_v27 }
 0x8e6   :  { %2477 = vpow2.f32 %v2069_v30 }
 0x8f1   :  { %v2476_v29 = vpop.eup %2475 }
 0x8f2   :  { %585 = vrot.lane.b32.xlu1 %v2476_v29, %s2585_s30 }
 0x8f3   :  { %v2478_v31 = vpop.eup %2477 }
 0x8f4   :  { %v579_v32 = vadd.f32 1.0, %v2478_v31 }
 0x8f6   :  { %2479 = vrcp.f32 %v579_v32 }
 0x903   :  { %v2480_v33 = vpop.eup %2479 }
 0x904   :  { %v583_v37 = vmul.f32 %v2480_v33, %v493_v20 }
 0x964   :  { %v586_v35 = vpop.permute.xlu1 %585 }
 0x965   :  { %v588_v36 = vmul.f32 %v2480_v33, %v586_v35 }
 0x967   :  { %590 = vrot.lane.b32.xlu0 %v588_v36, %s2585_s30 }
 0x9d9   :  { %v591_v38 = vpop.permute.xlu0 %590 }
 0x9da   :  { %v593_v39 = vadd.f32 %v591_v38, %v583_v37  ;;  %v2908_v38 = vld [vmem:[%s3141_s5 + $0x18] sm:$0xff] }
 0x9dc   :  { %2481 = vtanh.f32 %v593_v39 }
 0x9e9   :  { %v2482_v40 = vpop.eup %2481 }
 0x9ea   :  { %596 = vrot.lane.b32.xlu1 %v2482_v40, %s2585_s30  ;;  %v2921_v40 = vld [vmem:[%s3141_s5 + $0x8] sm:$0xff] }
 0xa5c   :  { %v597_v41 = vpop.permute.xlu1 %596 }
 0xa5d   :  { %v599_v42 = vmul.f32 %v2480_v33, %v597_v41  ;;  %v2928_v41 = vld [vmem:[%s3141_s5] sm:$0xff] }
 0xa5f   :  { %601 = vrot.lane.b32.xlu0 %v599_v42, %s2586_s3 }
 0xad1   :  { %v2837_v43 = vpop.permute.xlu0 %601 }
 0xad2   :  { %2292 = vmatmul.mubr.msk.f32.vlgmr.msra.gmra.mxu0 %vm62_vm1, %v2837_v43 }
 0xad3   :  { %2306 = vmatpush3.msra.mxu0 %v2668_v3  ;;  %2313 = vmatprep.mubr.msk.f32.mxu0 %vm2584_vm0, %v2583_v2 }
 0xad4   :  { %2307 = vmatprep.subr.mxu0 %v2583_v2 }
 0xad5   :  { %2308 = vmatpush3.msra.mxu0 %v2676_v4 }
 0xad6   :  { %2309 = vmatprep.subr.mxu0 %v2583_v2 }
 0xad7   :  { %2310 = vmatpush3.msra.mxu0 %v2689_v7 }
 0xad8   :  { %2311 = vmatprep.subr.mxu0 %v2583_v2 }
 0xad9   :  { %2312 = vmatpush3.msra.mxu0 %v2699_v9 }
 0xada   :  { %2327 = vmatprep.subr.mxu0 %v1013_v17 }
 0xb92   :  { %v671_v45 = vpop.f32.mrf.mxu0 }
 0xb93   :  { %v675_v46 = vadd.f32 %v671_v45, %v174_v44  ;;  %v2088_v44 = vld [vmem:[%s3139_s8 + $0x8] sm:$0xff] }
 0xb94   :  { %v2293_v47 = vpop.f32.mrf.mxu0 }
 0xb95   :  { %2483 = vtanh.f32 %v675_v46  ;;  %v2071_v49 = vmul.f32 -1.442695, %v675_v46  ;;  %v2087_v46 = vld [vmem:[%s3137_s7 + $0x8] sm:$0xff]  ;;  %v189_v47 = vadd.f32 %v2809_v63, %v2735_v14 }
 0xb97   :  { %2485 = vpow2.f32 %v2071_v49 }
 0xba2   :  { %v2484_v48 = vpop.eup %2483 }
 0xba3   :  { %685 = vrot.lane.b32.xlu1 %v2484_v48, %s2585_s30 }
 0xba4   :  { %v2486_v50 = vpop.eup %2485 }
 0xba5   :  { %v679_v51 = vadd.f32 1.0, %v2486_v50 }
 0xba7   :  { %2487 = vrcp.f32 %v679_v51 }
 0xbb4   :  { %v2488_v52 = vpop.eup %2487 }
 0xbb5   :  { %v683_v55 = vmul.f32 %v2488_v52, %v593_v39  ;;  %v2914_v39 = vld [vmem:[%s3141_s5 + $0x10] sm:$0xff] }
 0xc15   :  { %v686_v53 = vpop.permute.xlu1 %685 }
 0xc16   :  { %v688_v54 = vmul.f32 %v2488_v52, %v686_v53  ;;  %v2971_v53 = vld [vmem:[%s3142_s6] ss:$0 sm:$0xff] }
 0xc18   :  { %690 = vrot.lane.b32.xlu0 %v688_v54, %s2585_s30 }
 0xc8a   :  { %v691_v56 = vpop.permute.xlu0 %690 }
 0xc8b   :  { %v693_v57 = vadd.f32 %v691_v56, %v683_v55 }
 0xc8d   :  { %2489 = vtanh.f32 %v693_v57 }
 0xc9a   :  { %v2490_v59 = vpop.eup %2489 }
 0xc9b   :  { %696 = vrot.lane.b32.xlu1 %v2490_v59, %s2585_s30 }
 0xd0d   :  { %v697_v60 = vpop.permute.xlu1 %696 }
 0xd0e   :  { %v699_v62 = vmul.f32 %v2488_v52, %v697_v60 }
 0xd10   :  { %701 = vrot.lane.b32.xlu0 %v699_v62, %s2586_s3 }
 0xd82   :  { %v702_v1 = vpop.permute.xlu0 %701 }
 0xd83   :  { %2303 = vmatmul.mubr.msk.f32.vlgmr.msra.gmra.mxu1 %vm62_vm1, %v702_v1 }
 0xd84   :  { %2317 = vmatpush3.msra.mxu1 %v2668_v3  ;;  %2324 = vmatprep.mubr.msk.f32.mxu1 %vm2584_vm0, %v2583_v2  ;;  %v179_v3 = vadd.f32 %v2805_v61, %v2735_v14 }
 0xd85   :  { %2318 = vmatprep.subr.mxu1 %v2583_v2 }
 0xd86   :  { %2319 = vmatpush3.msra.mxu1 %v2676_v4 }
 0xd87   :  { %2320 = vmatprep.subr.mxu1 %v2583_v2 }
 0xd88   :  { %2321 = vmatpush3.msra.mxu1 %v2689_v7 }
 0xd89   :  { %2322 = vmatprep.subr.mxu1 %v2583_v2 }
 0xd8a   :  { %2323 = vmatpush3.msra.mxu1 %v2699_v9 }
 0xd8b   :  { %2347 = vmatprep.subr.mxu1 %v2583_v2 }
 0xe43   :  { %v771_v5 = vpop.f32.mrf.mxu1 }
 0xe44   :  { %v775_v6 = vadd.f32 %v771_v5, %v179_v3 }
 0xe45   :  { %v2304_v8 = vpop.f32.mrf.mxu1 }
 0xe46   :  { %2491 = vtanh.f32 %v775_v6  ;;  %v2073_v4 = vmul.f32 -1.442695, %v775_v6 }
 0xe48   :  { %2493 = vpow2.f32 %v2073_v4 }
 0xe53   :  { %v2492_v10 = vpop.eup %2491 }
 0xe54   :  { %785 = vrot.lane.b32.xlu1 %v2492_v10, %s2585_s30 }
 0xe55   :  { %v2494_v11 = vpop.eup %2493 }
 0xe56   :  { %v779_v7 = vadd.f32 1.0, %v2494_v11 }
 0xe58   :  { %2495 = vrcp.f32 %v779_v7 }
 0xe65   :  { %v2496_v12 = vpop.eup %2495 }
 0xe66   :  { %v783_v15 = vmul.f32 %v2496_v12, %v693_v57 }
 0xec6   :  { %v786_v13 = vpop.permute.xlu1 %785 }
 0xec7   :  { %v788_v9 = vmul.f32 %v2496_v12, %v786_v13 }
 0xec9   :  { %790 = vrot.lane.b32.xlu0 %v788_v9, %s2585_s30 }
 0xf3b   :  { %v791_v16 = vpop.permute.xlu0 %790 }
 0xf3c   :  { %v793_v61 = vadd.f32 %v791_v16, %v783_v15 }
 0xf3e   :  { %2497 = vtanh.f32 %v793_v61 }
 0xf4b   :  { %v2498_v18 = vpop.eup %2497 }
 0xf4c   :  { %796 = vrot.lane.b32.xlu1 %v2498_v18, %s2585_s30 }
 0xfbe   :  { %v797_v19 = vpop.permute.xlu1 %796 }
 0xfbf   :  { %v799_v20 = vmul.f32 %v2496_v12, %v797_v19 }
 0xfc1   :  { %801 = vrot.lane.b32.xlu0 %v799_v20, %s2586_s3 }
0x1033   :  { %v802_v21 = vpop.permute.xlu0 %801 }
0x1034   :  { %2314 = vmatmul.mubr.msk.f32.vlgmr.msra.gmra.mxu0 %vm62_vm1, %v802_v21 }
0x1035   :  { %2328 = vmatpush3.msra.mxu0 %v1013_v17  ;;  %2335 = vmatprep.mubr.msk.f32.mxu0 %vm62_vm1, %v2746_v34  ;;  %v184_v34 = vadd.f32 %v2735_v14, %v2811_v0 }
0x1036   :  { %2329 = vmatprep.subr.mxu0 %v1012_v22 }
0x1037   :  { %2330 = vmatpush3.msra.mxu0 %v1012_v22 }
0x1038   :  { %2331 = vmatprep.subr.mxu0 %v1011_v23 }
0x1039   :  { %2332 = vmatpush3.msra.mxu0 %v1011_v23 }
0x103a   :  { %2333 = vmatprep.subr.mxu0 %v1010_v25 }
0x103b   :  { %2334 = vmatpush3.msra.mxu0 %v1010_v25 }
0x103c   :  { %2336 = vmatmul.mubr.msk.f32.vlgmr.msra.gmra.mxu0 %vm62_vm1, %v2791_v58  ;;  %2369 = vmatprep.subr.mxu0 %v2583_v2 }
0x103d   :  { %2338 = vmatprep.mubr.msk.f32.mxu0 %vm62_vm1, %v2818_v24  ;;  %2370 = vmatpush3.msra.mxu0 %v2908_v38 }
0x103e   :  { %2371 = vmatprep.subr.mxu0 %v2583_v2 }
0x103f   :  { %2372 = vmatpush3.msra.mxu0 %v2914_v39 }
0x1040   :  { %2339 = vmatmul.mubr.msk.f32.gmra.mxu0 %vm62_vm1, %v2837_v43  ;;  %2373 = vmatprep.subr.mxu0 %v2583_v2 }
0x1041   :  { %2341 = vmatprep.mubr.msk.f32.mxu0 %vm62_vm1, %v702_v1  ;;  %2374 = vmatpush3.msra.mxu0 %v2921_v40 }
0x1042   :  { %2375 = vmatprep.subr.mxu0 %v2583_v2 }
0x1043   :  { %2376 = vmatpush3.msra.mxu0 %v2928_v41 }
0x1044   :  { %2342 = vmatmul.mubr.msk.f32.gmra.mxu0 %vm62_vm1, %v802_v21  ;;  %2391 = vmatprep.subr.mxu0 %v2583_v2 }
0x10f4   :  { %v871_v26 = vpop.f32.mrf.mxu0 }
0x10f5   :  { %v875_v27 = vadd.f32 %v871_v26, %v184_v34 }
0x10f6   :  { %v2315_v28 = vpop.f32.mrf.mxu0 }
0x10f7   :  { %2499 = vtanh.f32 %v875_v27  ;;  %v2075_v29 = vmul.f32 -1.442695, %v875_v27 }
0x10f9   :  { %2501 = vpow2.f32 %v2075_v29 }
0x10fc   :  { %v2966_v48 = vpop.f32.mrf.mxu0 }
0x10fd   :  { %v1095_v34 = vadd.f32 %v2966_v48, %v2971_v53 }
0x10fe   :  { %v1089_v52 = vpop.f32.mrf.mxu0 }
0x10ff   :  { %v1090_v54 = vadd.f32 %v2971_v53, %v1089_v52 }
0x1104   :  { %v2500_v58 = vpop.eup %2499 }
0x1105   :  { %885 = vrot.lane.b32.xlu1 %v2500_v58, %s2585_s30 }
0x1106   :  { %v2502_v24 = vpop.eup %2501 }
0x1107   :  { %v879_v30 = vadd.f32 1.0, %v2502_v24 }
0x1109   :  { %2503 = vrcp.f32 %v879_v30 }
0x1116   :  { %v2504_v31 = vpop.eup %2503 }
0x1117   :  { %v883_v35 = vmul.f32 %v2504_v31, %v793_v61 }
0x1177   :  { %v886_v32 = vpop.permute.xlu1 %885 }
0x1178   :  { %v888_v33 = vmul.f32 %v2504_v31, %v886_v32 }
0x117a   :  { %890 = vrot.lane.b32.xlu0 %v888_v33, %s2585_s30 }
0x11ec   :  { %v891_v36 = vpop.permute.xlu0 %890 }
0x11ed   :  { %v2901_v0 = vadd.f32 %v891_v36, %v883_v35 }
0x11ef   :  { %2505 = vtanh.f32 %v2901_v0 }
0x11fc   :  { %v2506_v37 = vpop.eup %2505 }
0x11fd   :  { %896 = vrot.lane.b32.xlu1 %v2506_v37, %s2585_s30 }
0x126f   :  { %v897_v42 = vpop.permute.xlu1 %896 }
0x1270   :  { %v899_v43 = vmul.f32 %v2504_v31, %v897_v42 }
0x1272   :  { %901 = vrot.lane.b32.xlu0 %v899_v43, %s2586_s3 }
0x1276   :  { %1218 = vrot.lane.b32.xlu0 %v2088_v44, %s2585_s30 }
0x12e4   :  { %v902_v45 = vpop.permute.xlu0 %901 }
0x12e5   :  { %2325 = vmatmul.mubr.msk.f32.vlgmr.msra.gmra.mxu1 %vm62_vm1, %v902_v45  ;;  %2344 = vmatprep.mubr.msk.f32.mxu0 %vm62_vm1, %v902_v45 }
0x12e6   :  { %2348 = vmatpush3.msra.mxu1 %v2908_v38  ;;  %2355 = vmatprep.mubr.msk.f32.mxu1 %vm2584_vm0, %v2583_v2 }
0x12e7   :  { %2349 = vmatprep.subr.mxu1 %v2583_v2 }
0x12e8   :  { %2350 = vmatpush3.msra.mxu1 %v2914_v39  ;;  %v1219_v5 = vpop.permute.xlu0 %1218 }
0x12e9   :  { %2351 = vmatprep.subr.mxu1 %v2583_v2 }
0x12ea   :  { %2352 = vmatpush3.msra.mxu1 %v2921_v40 }
0x12eb   :  { %2353 = vmatprep.subr.mxu1 %v2583_v2 }
0x12ec   :  { %2354 = vmatpush3.msra.mxu1 %v2928_v41 }
0x12ed   :  { %2356 = vmatmul.mubr.msk.f32.vlgmr.msra.gmra.mxu1 %vm62_vm1, %v2087_v46  ;;  %2358 = vmatprep.subr.mxu1 %v2583_v2  ;;  %v2340_v46 = vpop.f32.mrf.mxu0 }
0x12ee   :  { %2359 = vmatpush3.msra.mxu1 %v2908_v38  ;;  %2366 = vmatprep.mubr.msk.f32.mxu1 %vm2584_vm0, %v2583_v2 }
0x12ef   :  { %2360 = vmatprep.subr.mxu1 %v2583_v2 }
0x12f0   :  { %2361 = vmatpush3.msra.mxu1 %v2914_v39 }
0x12f1   :  { %2362 = vmatprep.subr.mxu1 %v2583_v2 }
0x12f2   :  { %2363 = vmatpush3.msra.mxu1 %v2921_v40 }
0x12f3   :  { %2364 = vmatprep.subr.mxu1 %v2583_v2 }
0x12f4   :  { %2365 = vmatpush3.msra.mxu1 %v2928_v41 }
0x12f5   :  { %2380 = vmatprep.subr.mxu1 %v2583_v2 }
0x13a5   :  { %v971_v49 = vpop.f32.mrf.mxu1 }
0x13a6   :  { %v975_v50 = vadd.f32 %v971_v49, %v189_v47  ;;  %v1099_v47 = vpop.f32.mrf.mxu0 }
0x13a7   :  { %v2326_v51 = vpop.f32.mrf.mxu1  ;;  %v1100_v52 = vadd.f32 %v2971_v53, %v1099_v47 }
0x13a8   :  { %v2077_v7 = vmul.f32 -1.442695, %v975_v50  ;;  %v3021_v48 = vpop.f32.mrf.mxu0 }
0x13aa   :  { %v3023_v49 = vpop.f32.mrf.mxu0 }
0x13ad   :  { %v1205_v55 = vpop.f32.mrf.mxu1 }
0x13ae   :  { %v1209_v56 = vadd.f32 %v1205_v55, %v1090_v54 }
0x13af   :  { %v2357_v57 = vpop.f32.mrf.mxu1 }
0x13b0   :  { %2507 = vtanh.f32 %v1209_v56  ;;  %v2090_v14 = vmul.f32 -1.442695, %v1209_v56 }
0x13b2   :  { %2509 = vpow2.f32 %v2090_v14 }
0x13bd   :  { %v2508_v59 = vpop.eup %2507 }
0x13be   :  { %1223 = vrot.lane.b32.xlu1 %v2508_v59, %s2585_s30 }
0x13bf   :  { %v2510_v63 = vpop.eup %2509 }
0x13c0   :  { %v1213_v60 = vadd.f32 1.0, %v2510_v63 }
0x13c2   :  { %2511 = vrcp.f32 %v1213_v60 }
0x13cf   :  { %v2512_v62 = vpop.eup %2511 }
0x13d0   :  { %v1221_v6 = vmul.f32 %v2512_v62, %v1219_v5 }
0x1430   :  { %v1224_v1 = vpop.permute.xlu1 %1223 }
0x1431   :  { %v1226_v3 = vmul.f32 %v2512_v62, %v1224_v1 }
0x1433   :  { %1228 = vrot.lane.b32.xlu1 %v1226_v3, %s2585_s30 }
0x14a5   :  { %v1229_v8 = vpop.permute.xlu1 %1228 }
0x14a6   :  { %v1231_v10 = vadd.f32 %v1229_v8, %v1221_v6 }
0x14a8   :  { %2513 = vtanh.f32 %v1231_v10 }
0x14a9   :  { %2515 = vtanh.f32 %v975_v50 }
0x14aa   :  { %2517 = vpow2.f32 %v2077_v7  ;;  %v1105_v7 = vadd.f32 %v2340_v46, %v2971_v53 }
0x14b5   :  { %v2514_v4 = vpop.eup %2513 }
0x14b6   :  { %1234 = vrot.lane.b32.xlu0 %v2514_v4, %s2585_s30  ;;  %v2516_v11 = vpop.eup %2515 }
0x14b7   :  { %v2518_v12 = vpop.eup %2517 }
0x14b8   :  { %v979_v13 = vadd.f32 1.0, %v2518_v12 }
0x14ba   :  { %985 = vrot.lane.b32.xlu0 %v2516_v11, %s2585_s30  ;;  %2519 = vrcp.f32 %v979_v13 }
0x14c7   :  { %v2520_v16 = vpop.eup %2519 }
0x14c8   :  { %v983_v19 = vmul.f32 %v2520_v16, %v2901_v0 }
0x1528   :  { %v1235_v9 = vpop.permute.xlu0 %1234 }
0x1529   :  { %v1237_v15 = vmul.f32 %v2512_v62, %v1235_v9 }
0x152b   :  { %1239 = vrot.lane.b32.xlu1 %v1237_v15, %s2586_s3 }
0x152c   :  { %v986_v61 = vpop.permute.xlu0 %985 }
0x152d   :  { %v988_v17 = vmul.f32 %v2520_v16, %v986_v61 }
0x152f   :  { %990 = vrot.lane.b32.xlu0 %v988_v17, %s2585_s30 }
0x159d   :  { %v1240_v18 = vpop.permute.xlu1 %1239 }
0x159e   :  { %2367 = vmatmul.mubr.msk.f32.vlgmr.msra.gmra.mxu1 %vm62_vm1, %v1240_v18 }
0x159f   :  { %2381 = vmatpush3.msra.mxu1 %v2908_v38  ;;  %2388 = vmatprep.mubr.msk.f32.mxu1 %vm2584_vm0, %v2583_v2 }
0x15a0   :  { %2382 = vmatprep.subr.mxu1 %v2583_v2 }
0x15a1   :  { %v991_v20 = vpop.permute.xlu0 %990  ;;  %2383 = vmatpush3.msra.mxu1 %v2914_v39 }
0x15a2   :  { %v2987_v21 = vadd.f32 %v991_v20, %v983_v19  ;;  %2384 = vmatprep.subr.mxu1 %v2583_v2 }
0x15a3   :  { %2385 = vmatpush3.msra.mxu1 %v2921_v40 }
0x15a4   :  { %2521 = vtanh.f32 %v2987_v21  ;;  %2386 = vmatprep.subr.mxu1 %v2583_v2 }
0x15a5   :  { %2387 = vmatpush3.msra.mxu1 %v2928_v41 }
0x15a6   :  { %2402 = vmatprep.subr.mxu1 %v2583_v2 }
0x15b1   :  { %v2522_v22 = vpop.eup %2521 }
0x15b2   :  { %996 = vrot.lane.b32.xlu0 %v2522_v22, %s2585_s30 }
0x1624   :  { %v997_v23 = vpop.permute.xlu0 %996 }
0x1625   :  { %v999_v25 = vmul.f32 %v2520_v16, %v997_v23 }
0x1627   :  { %1001 = vrot.lane.b32.xlu0 %v999_v25, %s2586_s3 }
0x165e   :  { %v1309_v26 = vpop.f32.mrf.mxu1 }
0x165f   :  { %v1313_v27 = vadd.f32 %v1309_v26, %v1095_v34 }
0x1660   :  { %v2368_v28 = vpop.f32.mrf.mxu1 }
0x1661   :  { %2523 = vtanh.f32 %v1313_v27  ;;  %v2092_v24 = vmul.f32 -1.442695, %v1313_v27 }
0x1663   :  { %2525 = vpow2.f32 %v2092_v24 }
0x166e   :  { %v2524_v58 = vpop.eup %2523 }
0x166f   :  { %1323 = vrot.lane.b32.xlu1 %v2524_v58, %s2585_s30  ;;  %v1110_v58 = vadd.f32 %v2971_v53, %v3023_v49 }
0x1670   :  { %v2526_v30 = vpop.eup %2525 }
0x1671   :  { %v1317_v31 = vadd.f32 1.0, %v2526_v30 }
0x1673   :  { %2527 = vrcp.f32 %v1317_v31 }
0x1680   :  { %v2528_v32 = vpop.eup %2527 }
0x1681   :  { %v1321_v36 = vmul.f32 %v2528_v32, %v1231_v10 }
0x1699   :  { %v1002_v29 = vpop.permute.xlu0 %1001 }
0x169a   :  { %1004 = vst.msk [vmem:[%s3143_s12] sm:$0xff] %vm62_vm1, %v1002_v29  ;;  %2345 = vmatmul.mubr.msk.f32.gmra.mxu0 %vm62_vm1, %v1002_v29 }
0x169b   :  { %2377 = vmatprep.mubr.msk.f32.mxu0 %vm2584_vm0, %v2583_v2 }
0x16e1   :  { %v1324_v33 = vpop.permute.xlu1 %1323 }
0x16e2   :  { %v1326_v35 = vmul.f32 %v2528_v32, %v1324_v33 }
0x16e4   :  { %1328 = vrot.lane.b32.xlu1 %v1326_v35, %s2585_s30 }
0x1756   :  { %v1329_v0 = vpop.permute.xlu1 %1328 }
0x1757   :  { %v1331_v37 = vadd.f32 %v1329_v0, %v1321_v36 }
0x1759   :  { %2529 = vtanh.f32 %v1331_v37 }
0x175a   :  { %v3025_v50 = vpop.f32.mrf.mxu0 }
0x175c   :  { %v3027_v51 = vpop.f32.mrf.mxu0 }
0x1766   :  { %v2530_v42 = vpop.eup %2529 }
0x1767   :  { %1334 = vrot.lane.b32.xlu1 %v2530_v42, %s2585_s30 }
0x17d9   :  { %v1335_v43 = vpop.permute.xlu1 %1334 }
0x17da   :  { %v1337_v44 = vmul.f32 %v2528_v32, %v1335_v43 }
0x17dc   :  { %1339 = vrot.lane.b32.xlu1 %v1337_v44, %s2586_s3 }
0x184e   :  { %v1340_v45 = vpop.permute.xlu1 %1339 }
0x184f   :  { %2378 = vmatmul.mubr.msk.f32.vlgmr.msra.gmra.mxu0 %vm62_vm1, %v1340_v45 }
0x1850   :  { %2392 = vmatpush3.msra.mxu0 %v2908_v38  ;;  %2399 = vmatprep.mubr.msk.f32.mxu0 %vm2584_vm0, %v2583_v2 }
0x1851   :  { %2393 = vmatprep.subr.mxu0 %v2583_v2 }
0x1852   :  { %2394 = vmatpush3.msra.mxu0 %v2914_v39 }
0x1853   :  { %2395 = vmatprep.subr.mxu0 %v2583_v2 }
0x1854   :  { %2396 = vmatpush3.msra.mxu0 %v2921_v40 }
0x1855   :  { %2397 = vmatprep.subr.mxu0 %v2583_v2 }
0x1856   :  { %2398 = vmatpush3.msra.mxu0 %v2928_v41 }
0x1857   :  { %2413 = vmatprep.subr.mxu0 %v2583_v2 }
0x190f   :  { %v1409_v54 = vpop.f32.mrf.mxu0 }
0x1910   :  { %v1413_v55 = vadd.f32 %v1409_v54, %v1100_v52  ;;  %v1115_v52 = vadd.f32 %v3021_v48, %v2971_v53 }
0x1911   :  { %v2379_v56 = vpop.f32.mrf.mxu0 }
0x1912   :  { %2531 = vtanh.f32 %v1413_v55  ;;  %v2094_v59 = vmul.f32 -1.442695, %v1413_v55 }
0x1914   :  { %2533 = vpow2.f32 %v2094_v59 }
0x191f   :  { %v2532_v57 = vpop.eup %2531 }
0x1920   :  { %1423 = vrot.lane.b32.xlu0 %v2532_v57, %s2585_s30 }
0x1921   :  { %v2534_v14 = vpop.eup %2533 }
0x1922   :  { %v1417_v63 = vadd.f32 1.0, %v2534_v14 }
0x1924   :  { %2535 = vrcp.f32 %v1417_v63 }
0x1931   :  { %v2536_v60 = vpop.eup %2535 }
0x1932   :  { %v1421_v3 = vmul.f32 %v2536_v60, %v1331_v37 }
0x1992   :  { %v1424_v62 = vpop.permute.xlu0 %1423 }
0x1993   :  { %v1426_v1 = vmul.f32 %v2536_v60, %v1424_v62 }
0x1995   :  { %1428 = vrot.lane.b32.xlu1 %v1426_v1, %s2585_s30 }
0x1a07   :  { %v1429_v5 = vpop.permute.xlu1 %1428 }
0x1a08   :  { %v1431_v6 = vadd.f32 %v1429_v5, %v1421_v3 }
0x1a0a   :  { %2537 = vtanh.f32 %v1431_v6 }
0x1a17   :  { %v2538_v8 = vpop.eup %2537 }
0x1a18   :  { %1434 = vrot.lane.b32.xlu0 %v2538_v8, %s2585_s30 }
0x1a8a   :  { %v1435_v10 = vpop.permute.xlu0 %1434 }
0x1a8b   :  { %v1437_v4 = vmul.f32 %v2536_v60, %v1435_v10 }
0x1a8d   :  { %1439 = vrot.lane.b32.xlu1 %v1437_v4, %s2586_s3 }
0x1aff   :  { %v1440_v11 = vpop.permute.xlu1 %1439 }
0x1b00   :  { %2389 = vmatmul.mubr.msk.f32.vlgmr.msra.gmra.mxu1 %vm62_vm1, %v1440_v11 }
0x1b01   :  { %2403 = vmatpush3.msra.mxu1 %v2908_v38  ;;  %2410 = vmatprep.mubr.msk.f32.mxu1 %vm2584_vm0, %v2583_v2 }
0x1b02   :  { %2404 = vmatprep.subr.mxu1 %v2583_v2 }
0x1b03   :  { %2405 = vmatpush3.msra.mxu1 %v2914_v39 }
0x1b04   :  { %2406 = vmatprep.subr.mxu1 %v2583_v2 }
0x1b05   :  { %2407 = vmatpush3.msra.mxu1 %v2921_v40 }
0x1b06   :  { %2408 = vmatprep.subr.mxu1 %v2583_v2 }
0x1b07   :  { %2409 = vmatpush3.msra.mxu1 %v2928_v41 }
0x1b08   :  { %2424 = vmatprep.subr.mxu1 %v2583_v2 }
0x1bc0   :  { %v1509_v12 = vpop.f32.mrf.mxu1 }
0x1bc1   :  { %v1513_v13 = vadd.f32 %v1509_v12, %v1105_v7 }
0x1bc2   :  { %v2390_v9 = vpop.f32.mrf.mxu1 }
0x1bc3   :  { %2539 = vtanh.f32 %v1513_v13  ;;  %v2096_v16 = vmul.f32 -1.442695, %v1513_v13 }
0x1bc5   :  { %2541 = vpow2.f32 %v2096_v16 }
0x1bd0   :  { %v2540_v15 = vpop.eup %2539 }
0x1bd1   :  { %1523 = vrot.lane.b32.xlu0 %v2540_v15, %s2585_s30 }
0x1bd2   :  { %v2542_v61 = vpop.eup %2541 }
0x1bd3   :  { %v1517_v17 = vadd.f32 1.0, %v2542_v61 }
0x1bd5   :  { %2543 = vrcp.f32 %v1517_v17 }
0x1be2   :  { %v2544_v18 = vpop.eup %2543 }
0x1be3   :  { %v1521_v22 = vmul.f32 %v2544_v18, %v1431_v6  ;;  %v1120_v6 = vadd.f32 %v2971_v53, %v3027_v51 }
0x1c43   :  { %v1524_v19 = vpop.permute.xlu0 %1523 }
0x1c44   :  { %v1526_v20 = vmul.f32 %v2544_v18, %v1524_v19 }
0x1c46   :  { %1528 = vrot.lane.b32.xlu1 %v1526_v20, %s2585_s30 }
0x1cb8   :  { %v1529_v23 = vpop.permute.xlu1 %1528 }
0x1cb9   :  { %v1531_v25 = vadd.f32 %v1529_v23, %v1521_v22  ;;  %v1125_v23 = vadd.f32 %v3025_v50, %v2971_v53  ;;  %v1953_v50 = vld [vmem:[%s3144_s9 + $0x18] sm:$0xff] }
0x1cbb   :  { %2545 = vtanh.f32 %v1531_v25 }
0x1cc8   :  { %v2546_v34 = vpop.eup %2545 }
0x1cc9   :  { %1534 = vrot.lane.b32.xlu0 %v2546_v34, %s2585_s30 }
0x1d3b   :  { %v1535_v26 = vpop.permute.xlu0 %1534 }
0x1d3c   :  { %v1537_v27 = vmul.f32 %v2544_v18, %v1535_v26 }
0x1d3e   :  { %1539 = vrot.lane.b32.xlu1 %v1537_v27, %s2586_s3 }
0x1db0   :  { %v1540_v28 = vpop.permute.xlu1 %1539 }
0x1db1   :  { %2400 = vmatmul.mubr.msk.f32.vlgmr.msra.gmra.mxu0 %vm62_vm1, %v1540_v28 }
0x1db2   :  { %2414 = vmatpush3.msra.mxu0 %v2908_v38  ;;  %2421 = vmatprep.mubr.msk.f32.mxu0 %vm2584_vm0, %v2583_v2 }
0x1db3   :  { %2415 = vmatprep.subr.mxu0 %v2583_v2 }
0x1db4   :  { %2416 = vmatpush3.msra.mxu0 %v2914_v39 }
0x1db5   :  { %2417 = vmatprep.subr.mxu0 %v2583_v2 }
0x1db6   :  { %2418 = vmatpush3.msra.mxu0 %v2921_v40 }
0x1db7   :  { %2419 = vmatprep.subr.mxu0 %v2583_v2 }
0x1db8   :  { %2420 = vmatpush3.msra.mxu0 %v2928_v41 }
0x1db9   :  { %2435 = vmatprep.subr.mxu0 %v2583_v2 }
0x1e71   :  { %v1609_v29 = vpop.f32.mrf.mxu0 }
0x1e72   :  { %v1613_v24 = vadd.f32 %v1609_v29, %v1110_v58 }
0x1e73   :  { %v2401_v30 = vpop.f32.mrf.mxu0 }
0x1e74   :  { %2547 = vtanh.f32 %v1613_v24  ;;  %v2098_v32 = vmul.f32 -1.442695, %v1613_v24 }
0x1e76   :  { %2549 = vpow2.f32 %v2098_v32 }
0x1e81   :  { %v2548_v31 = vpop.eup %2547 }
0x1e82   :  { %1623 = vrot.lane.b32.xlu0 %v2548_v31, %s2585_s30 }
0x1e83   :  { %v2550_v33 = vpop.eup %2549 }
0x1e84   :  { %v1617_v35 = vadd.f32 1.0, %v2550_v33 }
0x1e86   :  { %2551 = vrcp.f32 %v1617_v35  ;;  %v1952_v35 = vld [vmem:[%s3144_s9 + $0x10] sm:$0xff] }
0x1e93   :  { %v2552_v36 = vpop.eup %2551 }
0x1e94   :  { %v1621_v42 = vmul.f32 %v2552_v36, %v1531_v25 }
0x1ef4   :  { %v1624_v0 = vpop.permute.xlu0 %1623 }
0x1ef5   :  { %v1626_v37 = vmul.f32 %v2552_v36, %v1624_v0  ;;  %v1950_v0 = vld [vmem:[%s3144_s9] sm:$0xff] }
0x1ef7   :  { %1628 = vrot.lane.b32.xlu1 %v1626_v37, %s2585_s30 }
0x1f69   :  { %v1629_v43 = vpop.permute.xlu1 %1628 }
0x1f6a   :  { %v1631_v44 = vadd.f32 %v1629_v43, %v1621_v42  ;;  %v19_v42 = vstv %s3145_s10 }
0x1f6b   :  { %20 = vst [vmem:[#allocation2] sm:$0x1] %v19_v42 }
0x1f6c   :  { %2553 = vtanh.f32 %v1631_v44 }
0x1f79   :  { %v2554_v45 = vpop.eup %2553 }
0x1f7a   :  { %1634 = vrot.lane.b32.xlu0 %v2554_v45, %s2585_s30 }
0x1fec   :  { %v1635_v46 = vpop.permute.xlu0 %1634 }
0x1fed   :  { %v1637_v47 = vmul.f32 %v2552_v36, %v1635_v46  ;;  %v1951_v36 = vld [vmem:[%s3144_s9 + $0x8] sm:$0xff]  ;;  %v2107_v46 = vld [vmem:[#allocation2] ss:$0 sm:$0xff] }
0x1fef   :  { %1639 = vrot.lane.b32.xlu1 %v1637_v47, %s2586_s3 }
0x2061   :  { %v1640_v49 = vpop.permute.xlu1 %1639 }
0x2062   :  { %2411 = vmatmul.mubr.msk.f32.vlgmr.msra.gmra.mxu1 %vm62_vm1, %v1640_v49 }
0x2063   :  { %2425 = vmatpush3.msra.mxu1 %v2908_v38  ;;  %2432 = vmatprep.mubr.msk.f32.mxu1 %vm2584_vm0, %v2583_v2 }
0x2064   :  { %2426 = vmatprep.subr.mxu1 %v2583_v2 }
0x2065   :  { %2427 = vmatpush3.msra.mxu1 %v2914_v39 }
0x2066   :  { %2428 = vmatprep.subr.mxu1 %v2583_v2 }
0x2067   :  { %2429 = vmatpush3.msra.mxu1 %v2921_v40 }
0x2068   :  { %2430 = vmatprep.subr.mxu1 %v2583_v2 }
0x2069   :  { %2431 = vmatpush3.msra.mxu1 %v2928_v41 }
0x2122   :  { %v1709_v54 = vpop.f32.mrf.mxu1 }
0x2123   :  { %v1713_v38 = vadd.f32 %v1709_v54, %v1115_v52 }
0x2124   :  { %v2412_v55 = vpop.f32.mrf.mxu1 }
0x2125   :  { %2555 = vtanh.f32 %v1713_v38  ;;  %v2100_v57 = vmul.f32 -1.442695, %v1713_v38 }
0x2127   :  { %2557 = vpow2.f32 %v2100_v57 }
0x2132   :  { %v2556_v56 = vpop.eup %2555 }
0x2133   :  { %1723 = vrot.lane.b32.xlu0 %v2556_v56, %s2585_s30 }
0x2134   :  { %v2558_v39 = vpop.eup %2557 }
0x2135   :  { %v1717_v59 = vadd.f32 1.0, %v2558_v39 }
0x2137   :  { %2559 = vrcp.f32 %v1717_v59 }
0x2144   :  { %v2560_v40 = vpop.eup %2559 }
0x2145   :  { %v1721_v41 = vmul.f32 %v2560_v40, %v1631_v44 }
0x21a5   :  { %v1724_v14 = vpop.permute.xlu0 %1723 }
0x21a6   :  { %v1726_v63 = vmul.f32 %v2560_v40, %v1724_v14 }
0x21a8   :  { %1728 = vrot.lane.b32.xlu1 %v1726_v63, %s2585_s30 }
0x221a   :  { %v1729_v60 = vpop.permute.xlu1 %1728 }
0x221b   :  { %v1731_v48 = vadd.f32 %v1729_v60, %v1721_v41 }
0x221d   :  { %2561 = vtanh.f32 %v1731_v48 }
0x222a   :  { %v2562_v62 = vpop.eup %2561 }
0x222b   :  { %1734 = vrot.lane.b32.xlu0 %v2562_v62, %s2585_s30 }
0x229d   :  { %v1735_v1 = vpop.permute.xlu0 %1734 }
0x229e   :  { %v1737_v3 = vmul.f32 %v2560_v40, %v1735_v1 }
0x22a0   :  { %1739 = vrot.lane.b32.xlu1 %v1737_v3, %s2586_s3 }
0x2312   :  { %v1740_v5 = vpop.permute.xlu1 %1739 }
0x2313   :  { %2422 = vmatmul.mubr.msk.f32.vlgmr.msra.gmra.mxu0 %vm62_vm1, %v1740_v5 }
0x2314   :  { %2443 = vmatprep.mubr.msk.f32.mxu0 %vm2584_vm0, %v2583_v2  ;;  %2436 = vmatpush3.msra.mxu0 %v1953_v50 }
0x2315   :  { %2437 = vmatprep.subr.mxu0 %v2583_v2 }
0x2316   :  { %2438 = vmatpush3.msra.mxu0 %v1952_v35 }
0x2317   :  { %2439 = vmatprep.subr.mxu0 %v2583_v2 }
0x2318   :  { %2440 = vmatpush3.msra.mxu0 %v1951_v36 }
0x2319   :  { %2441 = vmatprep.subr.mxu0 %v2583_v2 }
0x231a   :  { %2442 = vmatpush3.msra.mxu0 %v1950_v0 }
0x23d3   :  { %v1809_v8 = vpop.f32.mrf.mxu0 }
0x23d4   :  { %v1813_v10 = vadd.f32 %v1809_v8, %v1120_v6 }
0x23d5   :  { %v2423_v4 = vpop.f32.mrf.mxu0 }
0x23d6   :  { %2563 = vtanh.f32 %v1813_v10  ;;  %v2102_v7 = vmul.f32 -1.442695, %v1813_v10 }
0x23d8   :  { %2565 = vpow2.f32 %v2102_v7 }
0x23e3   :  { %v2564_v11 = vpop.eup %2563 }
0x23e4   :  { %1823 = vrot.lane.b32.xlu0 %v2564_v11, %s2585_s30 }
0x23e5   :  { %v2566_v12 = vpop.eup %2565 }
0x23e6   :  { %v1817_v13 = vadd.f32 1.0, %v2566_v12 }
0x23e8   :  { %2567 = vrcp.f32 %v1817_v13 }
0x23f5   :  { %v2568_v9 = vpop.eup %2567 }
0x23f6   :  { %v1821_v61 = vmul.f32 %v2568_v9, %v1731_v48 }
0x2456   :  { %v1824_v15 = vpop.permute.xlu0 %1823 }
0x2457   :  { %v1826_v16 = vmul.f32 %v2568_v9, %v1824_v15 }
0x2459   :  { %1828 = vrot.lane.b32.xlu1 %v1826_v16, %s2585_s30 }
0x24cb   :  { %v1829_v17 = vpop.permute.xlu1 %1828 }
0x24cc   :  { %v1831_v51 = vadd.f32 %v1829_v17, %v1821_v61 }
0x24ce   :  { %2569 = vtanh.f32 %v1831_v51 }
0x24db   :  { %v2570_v18 = vpop.eup %2569 }
0x24dc   :  { %1834 = vrot.lane.b32.xlu0 %v2570_v18, %s2585_s30 }
0x254e   :  { %v1835_v19 = vpop.permute.xlu0 %1834 }
0x254f   :  { %v1837_v20 = vmul.f32 %v2568_v9, %v1835_v19 }
0x2551   :  { %1839 = vrot.lane.b32.xlu1 %v1837_v20, %s2586_s3 }
0x25c3   :  { %v1840_v22 = vpop.permute.xlu1 %1839 }
0x25c4   :  { %2433 = vmatmul.mubr.msk.f32.vlgmr.msra.gmra.mxu1 %vm62_vm1, %v1840_v22 }
0x2684   :  { %v1909_v25 = vpop.f32.mrf.mxu1 }
0x2685   :  { %v1913_v34 = vadd.f32 %v1909_v25, %v1125_v23 }
0x2686   :  { %v2434_v26 = vpop.f32.mrf.mxu1 }
0x2687   :  { %2571 = vtanh.f32 %v1913_v34  ;;  %v2104_v28 = vmul.f32 -1.442695, %v1913_v34 }
0x2689   :  { %2573 = vpow2.f32 %v2104_v28 }
0x2694   :  { %v2572_v27 = vpop.eup %2571 }
0x2695   :  { %1923 = vrot.lane.b32.xlu0 %v2572_v27, %s2585_s30 }
0x2696   :  { %v2574_v58 = vpop.eup %2573 }
0x2697   :  { %v1917_v29 = vadd.f32 1.0, %v2574_v58 }
0x2699   :  { %2575 = vrcp.f32 %v1917_v29 }
0x26a6   :  { %v2576_v24 = vpop.eup %2575 }
0x26a7   :  { %v1921_v32 = vmul.f32 %v2576_v24, %v1831_v51 }
0x2707   :  { %v1924_v30 = vpop.permute.xlu0 %1923 }
0x2708   :  { %v1926_v31 = vmul.f32 %v2576_v24, %v1924_v30 }
0x270a   :  { %1928 = vrot.lane.b32.xlu1 %v1926_v31, %s2585_s30 }
0x277c   :  { %v1929_v33 = vpop.permute.xlu1 %1928 }
0x277d   :  { %v1931_v53 = vadd.f32 %v1929_v33, %v1921_v32 }
0x277f   :  { %2577 = vtanh.f32 %v1931_v53 }
0x278c   :  { %v2578_v37 = vpop.eup %2577 }
0x278d   :  { %1934 = vrot.lane.b32.xlu0 %v2578_v37, %s2585_s30 }
0x2791   :  { %1006 = vrot.lane.b32.xlu0 %v2987_v21, %s2587_s4 }
0x27ff   :  { %v1935_v43 = vpop.permute.xlu0 %1934 }
0x2800   :  { %v1937_v44 = vmul.f32 %v2576_v24, %v1935_v43 }
0x2802   :  { %1939 = vrot.lane.b32.xlu1 %v1937_v44, %s2586_s3 }
0x2803   :  { %v1007_v45 = vpop.permute.xlu0 %1006 }
0x2804   :  { %1009 = vst.msk [vmem:[%s3146_s13] sm:$0xff] %vm62_vm1, %v1007_v45 }
0x2806   :  { %1945 = vrot.lane.b32.xlu1 %v1931_v53, %s2587_s4 }
0x2874   :  { %v1940_v2 = vpop.permute.xlu1 %1939 }
0x2875   :  { %2105 = vst.msk [vmem:[%s3143_s12 + $0x8] sm:$0xff] %vm62_vm1, %v1940_v2  ;;  %2444 = vmatmul.mubr.msk.f32.vlgmr.msra.gmra.mxu0 %vm62_vm1, %v1940_v2 }
0x2878   :  { %v1946_v21 = vpop.permute.xlu1 %1945 }
0x2879   :  { %2106 = vst.msk [vmem:[%s3146_s13 + $0x8] sm:$0xff] %vm62_vm1, %v1946_v21 }
0x2935   :  { %v2029_v47 = vpop.f32.mrf.mxu0 }
0x2936   :  { %v2030_v49 = vadd.f32 %v2107_v46, %v2029_v47 }
0x2937   :  { %v2445_v52 = vpop.f32.mrf.mxu0 }
0x2938   :  { %v2109_v54 = vmul.f32 -1.442695, %v2030_v49 }
0x293a   :  { %2579 = vpow2.f32 %v2109_v54 }
0x2947   :  { %v2580_v38 = vpop.eup %2579 }
0x2948   :  { %v2036_v55 = vadd.f32 1.0, %v2580_v38 }
0x294a   :  { %2581 = vrcp.f32 %v2036_v55 }
0x2957   :  { %v2582_v56 = vpop.eup %2581 }
0x2958   :  { %2040 = vst.msk [vmem:[%s3147_s11] sm:$0xff] %vm2039_vm2, %v2582_v56 }

</bundles_post_ra>
